<compile_context>
chip_gen: v6e
topology: v6e:2x2x1
jax: 0.10.0
libtpu: 0.0.40
codegen_flags: <defaults>
</compile_context>

<pallas_src>
import math

import jax
import jax.numpy as jnp
from jax.experimental import pallas as pl
from jax.experimental.pallas import tpu as pltpu

_BN_EPS = 1e-5
_KERNEL_SIZES = (8, 5, 3)
_SUBLANE_ALIGN = 16            # bf16 sublane tile -> keeps the stacked-tap concat aligned


def _round_up(v, m):
    return (v + m - 1) // m * m


# ---------------------------------------------------------------------------
# Fused Pallas kernel: one grid step == B_t lane-concatenated samples,
# full ResNetBlock forward (3x ConvBlock + optional 1x1-conv residual).
# ---------------------------------------------------------------------------

def _make_resnet_block_kernel(match_channels: bool, kernel_sizes, sample_len: int):
    max_k = max(kernel_sizes)
    pad_left_max = (max_k - 1) // 2
    # All lane shifts any layer will need (k=8 covers k=5 and k=3).
    all_shifts = [s for s in range(-pad_left_max, max_k - pad_left_max) if s != 0]

    def kernel(*refs):
        if match_channels:
            (x_ref, w1_ref, b1_ref, w2_ref, b2_ref, w3_ref, b3_ref,
             wr_ref, br_ref, o_ref) = refs
        else:
            (x_ref, w1_ref, b1_ref, w2_ref, b2_ref, w3_ref, b3_ref, o_ref) = refs

        total = x_ref.shape[-1]            # B_t * L lanes (samples concatenated on lanes)
        x = x_ref[0]                       # (C_in_pad, B_t*L) f32

        # Per-shift sample-boundary masks: computed ONCE per grid step from one lane
        # iota and reused by every conv layer (removes per-tap iota/compare VPU work).
        lane = jax.lax.broadcasted_iota(jnp.int32, (1, total), 1)
        if sample_len & (sample_len - 1) == 0:
            pos = jnp.bitwise_and(lane, sample_len - 1)      # lane position within sample
        else:
            pos = jax.lax.rem(lane, sample_len)
        masks = {s: (pos >= -s) & (pos < sample_len - s) for s in all_shifts}

        def conv_same(h, k, w_ref_, b_ref_, relu):
            # h: (C_in, B_t*L) f32.  w_ref_: (C_out, K*C_in_pad) bf16, tap-major/channel-minor
            # (BN folded in).  b_ref_: (C_out, 1) f32 (conv bias + BN shift).
            kcin = w_ref_.shape[1]
            cin_pad = kcin // k
            if h.shape[0] < cin_pad:       # generic path; no-op for aligned channel counts
                h = jnp.pad(h, ((0, cin_pad - h.shape[0]), (0, 0)))
            pad_left = (k - 1) // 2        # PyTorch conv1d_same_padding: extra pad on the right
            views = []
            for kk in range(k):            # static unroll, K <= 8 -- builds the stacked RHS
                s = kk - pad_left          # view kk holds x[:, l + s], zero outside the sample
                if s == 0:
                    views.append(h)
                else:
                    rolled = pltpu.roll(h, (-s) % total, axis=1)      # XLU, ~free
                    views.append(jnp.where(masks[s], rolled, 0.0))
            # ONE stacked matmul per layer: (C_out, K*C_in) x (K*C_in, B_t*L), f32 acc.
            rhs = views[0] if k == 1 else jnp.concatenate(views, axis=0)
            acc = jnp.dot(w_ref_[...], rhs.astype(jnp.bfloat16),
                          preferred_element_type=jnp.float32)
            acc = acc + b_ref_[...]        # (C_out, 1) broadcast over lanes
            if relu:
                acc = jnp.maximum(acc, 0.0)
            return acc

        h = conv_same(x, kernel_sizes[0], w1_ref, b1_ref, True)   # ConvBlock k=8
        h = conv_same(h, kernel_sizes[1], w2_ref, b2_ref, True)   # ConvBlock k=5
        h = conv_same(h, kernel_sizes[2], w3_ref, b3_ref, True)   # ConvBlock k=3
        if match_channels:                                        # residual 1x1 conv + BN
            h = h + conv_same(x, 1, wr_ref, br_ref, False)
        o_ref[0] = h.astype(o_ref.dtype)

    return kernel


def _pick_samples_per_step(n, max_per_step=32):
    """Largest divisor of n <= max_per_step; when n >= 4 prefer >=2 grid steps so both
    v7x TensorCores get work, otherwise maximize lane width (>=256-lane RHS target)."""
    divisors = [d for d in range(1, min(n, max_per_step) + 1) if n % d == 0]
    best = divisors[-1]
    if n >= 4:
        two_step = [d for d in divisors if n // d >= 2]
        if two_step:
            best = two_step[-1]
    return best


def resnet_block_forward(x, folded, samples_per_step=None):
    """x: (N, C_in, L) f32 (PyTorch NCL).  folded: BN-folded stacked-tap weights/biases."""
    n, c_in, length = x.shape
    k1 = _KERNEL_SIZES[0]
    c_in_pad = folded["w1"].shape[1] // k1
    c_out = folded["w1"].shape[0]
    match_channels = "wr" in folded

    bt = samples_per_step if samples_per_step is not None else _pick_samples_per_step(n)
    assert n % bt == 0, (n, bt)
    g = n // bt
    total = bt * length

    # Zero-pad input channels to the aligned count baked into the folded weights
    # (weights carry matching zero columns, so the math is unchanged).
    if c_in_pad != c_in:
        x = jnp.pad(x, ((0, 0), (0, c_in_pad - c_in), (0, 0)))
    # (N, C, L) -> (G, C, B_t*L): each grid step gets one lane-dense slab of B_t samples.
    xg = (x.reshape(g, bt, c_in_pad, length)
           .transpose(0, 2, 1, 3)
           .reshape(g, c_in_pad, total))

    in_specs = [pl.BlockSpec((1, c_in_pad, total), lambda i: (i, 0, 0))]
    args = [xg]
    order = [("w1", "b1"), ("w2", "b2"), ("w3", "b3")]
    if match_channels:
        order.append(("wr", "br"))
    for wname, bname in order:
        w, b = folded[wname], folded[bname]
        in_specs.append(pl.BlockSpec(w.shape, lambda i: (0, 0)))   # resident weight slab
        in_specs.append(pl.BlockSpec(b.shape, lambda i: (0, 0)))
        args.extend([w, b])

    out = pl.pallas_call(
        _make_resnet_block_kernel(match_channels, _KERNEL_SIZES, length),
        grid=(g,),
        in_specs=in_specs,
        out_specs=pl.BlockSpec((1, c_out, total), lambda i: (i, 0, 0)),
        out_shape=jax.ShapeDtypeStruct((g, c_out, total), jnp.float32),
        compiler_params=pltpu.CompilerParams(dimension_semantics=("parallel",)),
    )(*args)

    # (G, C_out, B_t*L) -> (N, C_out, L)
    return (out.reshape(g, c_out, bt, length)
               .transpose(0, 2, 1, 3)
               .reshape(n, c_out, length))


# ---------------------------------------------------------------------------
# Parameters (deterministic) and eval-mode BN folding (done once, outside the kernel).
# ---------------------------------------------------------------------------

def _init_conv_bn(key, c_in, c_out, k):
    kw, kb, kg, kbt, km, kv = jax.random.split(key, 6)
    fan_in = c_in * k
    w = jax.random.normal(kw, (c_out, c_in, k), jnp.float32) * math.sqrt(2.0 / fan_in)
    bound = 1.0 / math.sqrt(fan_in)
    b = jax.random.uniform(kb, (c_out,), jnp.float32, -bound, bound)
    bn = dict(
        gamma=jax.random.uniform(kg, (c_out,), jnp.float32, 0.8, 1.2),
        beta=jax.random.uniform(kbt, (c_out,), jnp.float32, -0.3, 0.3),
        mean=jax.random.uniform(km, (c_out,), jnp.float32, -0.3, 0.3),
        var=jax.random.uniform(kv, (c_out,), jnp.float32, 0.8, 1.2),
    )
    return dict(w=w, b=b, bn=bn)


def init_resnet_block_params(key, c_in, c_out):
    ks = jax.random.split(key, 4)
    channels = [c_in, c_out, c_out, c_out]
    params = {"cb%d" % (i + 1): _init_conv_bn(ks[i], channels[i], channels[i + 1],
                                              _KERNEL_SIZES[i])
              for i in range(3)}
    if c_in != c_out:                      # match_channels path of ResNetBlock
        params["res"] = _init_conv_bn(ks[3], c_in, c_out, 1)
    return params


def _fold_conv_bn(p, c_in_pad):
    # BN(conv(x)+b) = conv_{w*scale}(x) + (scale*(b-mean)+beta),  scale = gamma/sqrt(var+eps)
    bn = p["bn"]
    scale = bn["gamma"] / jnp.sqrt(bn["var"] + _BN_EPS)
    w = p["w"] * scale[:, None, None]                          # (C_out, C_in, K)
    b = (p["b"] - bn["mean"]) * scale + bn["beta"]             # (C_out,)
    c_out, c_in, k = w.shape
    w = jnp.pad(w, ((0, 0), (0, c_in_pad - c_in), (0, 0)))     # zero cols for padded channels
    # Stacked-tap MXU layout: (C_out, K*C_in_pad), tap-major / channel-minor, bf16.
    w2d = jnp.transpose(w, (0, 2, 1)).reshape(c_out, k * c_in_pad).astype(jnp.bfloat16)
    return w2d, b.reshape(-1, 1).astype(jnp.float32)


def fold_params(params):
    c_out, c_in, _ = params["cb1"]["w"].shape
    cin_pad = _round_up(c_in, _SUBLANE_ALIGN)
    cmid_pad = _round_up(c_out, _SUBLANE_ALIGN)
    folded = {}
    folded["w1"], folded["b1"] = _fold_conv_bn(params["cb1"], cin_pad)
    folded["w2"], folded["b2"] = _fold_conv_bn(params["cb2"], cmid_pad)
    folded["w3"], folded["b3"] = _fold_conv_bn(params["cb3"], cmid_pad)
    if "res" in params:
        folded["wr"], folded["br"] = _fold_conv_bn(params["res"], cin_pad)
    return folded


# ---------------------------------------------------------------------------
# Pure-jnp references (no Pallas) used to verify the kernel.
# ---------------------------------------------------------------------------

def _conv1d_same(x, w_oik, b, length, precision):
    # x: (N, C_in, L); w_oik[kk]: (C_out, C_in); Conv1dSamePadding semantics, stride=1.
    k = w_oik.shape[0]
    pad_left = (k - 1) // 2
    pad_right = (k - 1) - pad_left
    xp = jnp.pad(x, ((0, 0), (0, 0), (pad_left, pad_right)))
    acc = jnp.zeros((x.shape[0], w_oik.shape[1], length), jnp.float32)
    for kk in range(k):
        acc = acc + jnp.einsum("oi,nil->nol", w_oik[kk], xp[:, :, kk:kk + length],
                               precision=precision)
    return acc + b[None, :, :]


def reference_f32(params, x):
    """Faithful f32 ResNetBlock.forward (eval-mode BN), no folding / no bf16."""
    hi = jax.lax.Precision.HIGHEST
    length = x.shape[-1]

    def conv_block(p, h, relu):
        w_oik = jnp.transpose(p["w"], (2, 0, 1))
        y = _conv1d_same(h, w_oik, p["b"].reshape(-1, 1), length, hi)
        bn = p["bn"]
        scale = (bn["gamma"] / jnp.sqrt(bn["var"] + _BN_EPS))[None, :, None]
        y = (y - bn["mean"][None, :, None]) * scale + bn["beta"][None, :, None]
        return jnp.maximum(y, 0.0) if relu else y

    h = conv_block(params["cb1"], x, True)
    h = conv_block(params["cb2"], h, True)
    h = conv_block(params["cb3"], h, True)
    if "res" in params:
        h = h + conv_block(params["res"], x, False)
    return h


def reference_folded(folded, x):
    """Identical math to the kernel (folded bf16 stacked-tap weights, bf16-quantized
    activations into the dots, f32 accumulation) implemented with plain jnp."""
    hi = jax.lax.Precision.HIGHEST
    length = x.shape[-1]

    def conv(h, w2d, b, k, relu):
        cin_pad = w2d.shape[1] // k
        if h.shape[1] < cin_pad:
            h = jnp.pad(h, ((0, 0), (0, cin_pad - h.shape[1]), (0, 0)))
        hq = h.astype(jnp.bfloat16).astype(jnp.float32)
        w_oik = jnp.transpose(w2d.reshape(w2d.shape[0], k, cin_pad),
                              (1, 0, 2)).astype(jnp.float32)
        y = _conv1d_same(hq, w_oik, b, length, hi)
        return jnp.maximum(y, 0.0) if relu else y

    h = conv(x, folded["w1"], folded["b1"], _KERNEL_SIZES[0], True)
    h = conv(h, folded["w2"], folded["b2"], _KERNEL_SIZES[1], True)
    h = conv(h, folded["w3"], folded["b3"], _KERNEL_SIZES[2], True)
    if "wr" in folded:
        h = h + conv(x, folded["wr"], folded["br"], 1, False)
    return h


# ---------------------------------------------------------------------------
# Driver
# ---------------------------------------------------------------------------

if __name__ == "__main__":
    key = jax.random.PRNGKey(0)
    k_p1, k_p2, k_x1, k_x2 = jax.random.split(key, 4)

    fwd = jax.jit(resnet_block_forward, static_argnames=("samples_per_step",))

    # Case 1: in_channels != out_channels -> residual 1x1 conv + BN branch active.
    # batch=8 packs into 2 grid steps of 4 lane-concatenated samples (512-lane RHS).
    batch, c_in, c_out, length = 8, 12, 32, 128
    params = init_resnet_block_params(k_p1, c_in, c_out)
    folded = fold_params(params)
    x = jax.random.normal(k_x1, (batch, c_in, length), jnp.float32)

    out = jax.block_until_ready(fwd(x, folded))
    assert out.shape == (batch, c_out, length), out.shape
    assert bool(jnp.all(jnp.isfinite(out)))
    # Tight check vs. identical-math (folded, bf16-quantized) jnp reference.
    assert bool(jnp.allclose(out, reference_folded(folded, x), rtol=1e-3, atol=1e-3))
    # Loose check vs. faithful un-folded f32 module semantics (bf16 drift only).
    assert bool(jnp.allclose(out, reference_f32(params, x), rtol=1e-1, atol=2e-1))

    # Case 2: in_channels == out_channels -> match_channels=False (no residual conv).
    # Tiny batch=2 packs into a single 256-lane grid step.
    batch2, c_eq = 2, 16
    params2 = init_resnet_block_params(k_p2, c_eq, c_eq)
    folded2 = fold_params(params2)
    x2 = jax.random.normal(k_x2, (batch2, c_eq, length), jnp.float32)

    out2 = jax.block_until_ready(fwd(x2, folded2))
    assert out2.shape == (batch2, c_eq, length), out2.shape
    assert bool(jnp.all(jnp.isfinite(out2)))
    assert bool(jnp.allclose(out2, reference_folded(folded2, x2), rtol=1e-3, atol=1e-3))
    assert bool(jnp.allclose(out2, reference_f32(params2, x2), rtol=1e-1, atol=2e-1))

    print("KERNEL_OK")
</pallas_src>

<mosaic_0001>
module attributes {stable_mosaic.version = 11 : i64} {
  func.func @kernel(%arg0: i32, %arg1: memref<1x16x512xf32, #tpu.memory_space<vmem>>, %arg2: memref<32x128xbf16, #tpu.memory_space<vmem>>, %arg3: memref<32x1xf32, #tpu.memory_space<vmem>>, %arg4: memref<32x160xbf16, #tpu.memory_space<vmem>>, %arg5: memref<32x1xf32, #tpu.memory_space<vmem>>, %arg6: memref<32x96xbf16, #tpu.memory_space<vmem>>, %arg7: memref<32x1xf32, #tpu.memory_space<vmem>>, %arg8: memref<32x16xbf16, #tpu.memory_space<vmem>>, %arg9: memref<32x1xf32, #tpu.memory_space<vmem>>, %arg10: memref<1x32x512xf32, #tpu.memory_space<vmem>>) attributes {dimension_semantics = [#tpu.dimension_semantics<parallel>], iteration_bounds = array<i64: 2>, scalar_prefetch = 0 : i64, scratch_operands = 0 : i64, tpu.core_type = #tpu.core_type<tc>, window_params = [{transform_indices = @transform_0, window_bounds = array<i64: 1, 16, 512>}, {pipeline_mode = #tpu.pipeline_mode<synchronous>, transform_indices = @transform_1, window_bounds = array<i64: 32, 128>}, {pipeline_mode = #tpu.pipeline_mode<synchronous>, transform_indices = @transform_2, window_bounds = array<i64: 32, 1>}, {pipeline_mode = #tpu.pipeline_mode<synchronous>, transform_indices = @transform_3, window_bounds = array<i64: 32, 160>}, {pipeline_mode = #tpu.pipeline_mode<synchronous>, transform_indices = @transform_4, window_bounds = array<i64: 32, 1>}, {pipeline_mode = #tpu.pipeline_mode<synchronous>, transform_indices = @transform_5, window_bounds = array<i64: 32, 96>}, {pipeline_mode = #tpu.pipeline_mode<synchronous>, transform_indices = @transform_6, window_bounds = array<i64: 32, 1>}, {pipeline_mode = #tpu.pipeline_mode<synchronous>, transform_indices = @transform_7, window_bounds = array<i64: 32, 16>}, {pipeline_mode = #tpu.pipeline_mode<synchronous>, transform_indices = @transform_8, window_bounds = array<i64: 32, 1>}, {transform_indices = @transform_9, window_bounds = array<i64: 1, 32, 512>}]} {
    %c0 = arith.constant 0 : index
    %c0_0 = arith.constant 0 : index
    %c0_1 = arith.constant 0 : index
    %0 = vector.load %arg1[%c0, %c0_0, %c0_1] : memref<1x16x512xf32, #tpu.memory_space<vmem>>, vector<1x16x512xf32>
    %1 = vector.shape_cast %0 : vector<1x16x512xf32> to vector<16x512xf32>
    %2 = tpu.iota {dimensions = array<i32: 1>} : vector<1x512xi32>
    %c127_i32 = arith.constant 127 : i32
    %3 = vector.broadcast %c127_i32 : i32 to vector<1x512xi32>
    %4 = arith.andi %2, %3 : vector<1x512xi32>
    %c3_i32 = arith.constant 3 : i32
    %5 = vector.broadcast %c3_i32 : i32 to vector<1x512xi32>
    %6 = arith.cmpi sge, %4, %5 : vector<1x512xi32>
    %c131_i32 = arith.constant 131 : i32
    %7 = vector.broadcast %c131_i32 : i32 to vector<1x512xi32>
    %8 = arith.cmpi slt, %4, %7 : vector<1x512xi32>
    %9 = arith.andi %6, %8 : vector<1x512xi1>
    %c2_i32 = arith.constant 2 : i32
    %10 = vector.broadcast %c2_i32 : i32 to vector<1x512xi32>
    %11 = arith.cmpi sge, %4, %10 : vector<1x512xi32>
    %c130_i32 = arith.constant 130 : i32
    %12 = vector.broadcast %c130_i32 : i32 to vector<1x512xi32>
    %13 = arith.cmpi slt, %4, %12 : vector<1x512xi32>
    %14 = arith.andi %11, %13 : vector<1x512xi1>
    %c1_i32 = arith.constant 1 : i32
    %15 = vector.broadcast %c1_i32 : i32 to vector<1x512xi32>
    %16 = arith.cmpi sge, %4, %15 : vector<1x512xi32>
    %c129_i32 = arith.constant 129 : i32
    %17 = vector.broadcast %c129_i32 : i32 to vector<1x512xi32>
    %18 = arith.cmpi slt, %4, %17 : vector<1x512xi32>
    %19 = arith.andi %16, %18 : vector<1x512xi1>
    %c-1_i32 = arith.constant -1 : i32
    %20 = vector.broadcast %c-1_i32 : i32 to vector<1x512xi32>
    %21 = arith.cmpi sge, %4, %20 : vector<1x512xi32>
    %c127_i32_2 = arith.constant 127 : i32
    %22 = vector.broadcast %c127_i32_2 : i32 to vector<1x512xi32>
    %23 = arith.cmpi slt, %4, %22 : vector<1x512xi32>
    %24 = arith.andi %21, %23 : vector<1x512xi1>
    %c-2_i32 = arith.constant -2 : i32
    %25 = vector.broadcast %c-2_i32 : i32 to vector<1x512xi32>
    %26 = arith.cmpi sge, %4, %25 : vector<1x512xi32>
    %c126_i32 = arith.constant 126 : i32
    %27 = vector.broadcast %c126_i32 : i32 to vector<1x512xi32>
    %28 = arith.cmpi slt, %4, %27 : vector<1x512xi32>
    %29 = arith.andi %26, %28 : vector<1x512xi1>
    %c-3_i32 = arith.constant -3 : i32
    %30 = vector.broadcast %c-3_i32 : i32 to vector<1x512xi32>
    %31 = arith.cmpi sge, %4, %30 : vector<1x512xi32>
    %c125_i32 = arith.constant 125 : i32
    %32 = vector.broadcast %c125_i32 : i32 to vector<1x512xi32>
    %33 = arith.cmpi slt, %4, %32 : vector<1x512xi32>
    %34 = arith.andi %31, %33 : vector<1x512xi1>
    %c-4_i32 = arith.constant -4 : i32
    %35 = vector.broadcast %c-4_i32 : i32 to vector<1x512xi32>
    %36 = arith.cmpi sge, %4, %35 : vector<1x512xi32>
    %c124_i32 = arith.constant 124 : i32
    %37 = vector.broadcast %c124_i32 : i32 to vector<1x512xi32>
    %38 = arith.cmpi slt, %4, %37 : vector<1x512xi32>
    %39 = arith.andi %36, %38 : vector<1x512xi1>
    %c3_i32_3 = arith.constant 3 : i32
    %40 = tpu.dynamic_rotate %1 by %c3_i32_3 dim 1 : vector<16x512xf32>, i32 -> vector<16x512xf32>
    %cst = arith.constant 0.000000e+00 : f32
    %41 = vector.shape_cast %9 : vector<1x512xi1> to vector<1x512xi1>
    %42 = vector.broadcast %41 : vector<1x512xi1> to vector<16x512xi1>
    %43 = vector.broadcast %cst : f32 to vector<16x512xf32>
    %44 = arith.select %42, %40, %43 : vector<16x512xi1>, vector<16x512xf32>
    %c2_i32_4 = arith.constant 2 : i32
    %45 = tpu.dynamic_rotate %1 by %c2_i32_4 dim 1 : vector<16x512xf32>, i32 -> vector<16x512xf32>
    %cst_5 = arith.constant 0.000000e+00 : f32
    %46 = vector.shape_cast %14 : vector<1x512xi1> to vector<1x512xi1>
    %47 = vector.broadcast %46 : vector<1x512xi1> to vector<16x512xi1>
    %48 = vector.broadcast %cst_5 : f32 to vector<16x512xf32>
    %49 = arith.select %47, %45, %48 : vector<16x512xi1>, vector<16x512xf32>
    %c1_i32_6 = arith.constant 1 : i32
    %50 = tpu.dynamic_rotate %1 by %c1_i32_6 dim 1 : vector<16x512xf32>, i32 -> vector<16x512xf32>
    %cst_7 = arith.constant 0.000000e+00 : f32
    %51 = vector.shape_cast %19 : vector<1x512xi1> to vector<1x512xi1>
    %52 = vector.broadcast %51 : vector<1x512xi1> to vector<16x512xi1>
    %53 = vector.broadcast %cst_7 : f32 to vector<16x512xf32>
    %54 = arith.select %52, %50, %53 : vector<16x512xi1>, vector<16x512xf32>
    %c511_i32 = arith.constant 511 : i32
    %55 = tpu.dynamic_rotate %1 by %c511_i32 dim 1 : vector<16x512xf32>, i32 -> vector<16x512xf32>
    %cst_8 = arith.constant 0.000000e+00 : f32
    %56 = vector.shape_cast %24 : vector<1x512xi1> to vector<1x512xi1>
    %57 = vector.broadcast %56 : vector<1x512xi1> to vector<16x512xi1>
    %58 = vector.broadcast %cst_8 : f32 to vector<16x512xf32>
    %59 = arith.select %57, %55, %58 : vector<16x512xi1>, vector<16x512xf32>
    %c510_i32 = arith.constant 510 : i32
    %60 = tpu.dynamic_rotate %1 by %c510_i32 dim 1 : vector<16x512xf32>, i32 -> vector<16x512xf32>
    %cst_9 = arith.constant 0.000000e+00 : f32
    %61 = vector.shape_cast %29 : vector<1x512xi1> to vector<1x512xi1>
    %62 = vector.broadcast %61 : vector<1x512xi1> to vector<16x512xi1>
    %63 = vector.broadcast %cst_9 : f32 to vector<16x512xf32>
    %64 = arith.select %62, %60, %63 : vector<16x512xi1>, vector<16x512xf32>
    %c509_i32 = arith.constant 509 : i32
    %65 = tpu.dynamic_rotate %1 by %c509_i32 dim 1 : vector<16x512xf32>, i32 -> vector<16x512xf32>
    %cst_10 = arith.constant 0.000000e+00 : f32
    %66 = vector.shape_cast %34 : vector<1x512xi1> to vector<1x512xi1>
    %67 = vector.broadcast %66 : vector<1x512xi1> to vector<16x512xi1>
    %68 = vector.broadcast %cst_10 : f32 to vector<16x512xf32>
    %69 = arith.select %67, %65, %68 : vector<16x512xi1>, vector<16x512xf32>
    %c508_i32 = arith.constant 508 : i32
    %70 = tpu.dynamic_rotate %1 by %c508_i32 dim 1 : vector<16x512xf32>, i32 -> vector<16x512xf32>
    %cst_11 = arith.constant 0.000000e+00 : f32
    %71 = vector.shape_cast %39 : vector<1x512xi1> to vector<1x512xi1>
    %72 = vector.broadcast %71 : vector<1x512xi1> to vector<16x512xi1>
    %73 = vector.broadcast %cst_11 : f32 to vector<16x512xf32>
    %74 = arith.select %72, %70, %73 : vector<16x512xi1>, vector<16x512xf32>
    %75 = tpu.concatenate %44, %49, %54, %1, %59, %64, %69, %74 in 0 : vector<16x512xf32>, vector<16x512xf32>, vector<16x512xf32>, vector<16x512xf32>, vector<16x512xf32>, vector<16x512xf32>, vector<16x512xf32>, vector<16x512xf32> -> vector<128x512xf32>
    %c0_12 = arith.constant 0 : index
    %c0_13 = arith.constant 0 : index
    %76 = vector.load %arg2[%c0_12, %c0_13] : memref<32x128xbf16, #tpu.memory_space<vmem>>, vector<32x128xbf16>
    %77 = arith.truncf %75 : vector<128x512xf32> to vector<128x512xbf16>
    %cst_14 = arith.constant dense<0.000000e+00> : vector<32x512xf32>
    %78 = tpu.matmul %76, %77, %cst_14 {dimension_numbers = #tpu.dot_dimension_numbers<[1], [0], [0], [1], [0, 0, 1, 1], [], []>} : vector<32x128xbf16>, vector<128x512xbf16>, vector<32x512xf32> -> vector<32x512xf32>
    %c0_15 = arith.constant 0 : index
    %c0_16 = arith.constant 0 : index
    %79 = vector.load %arg3[%c0_15, %c0_16] : memref<32x1xf32, #tpu.memory_space<vmem>>, vector<32x1xf32>
    %80 = vector.broadcast %79 : vector<32x1xf32> to vector<32x512xf32>
    %81 = arith.addf %78, %80 : vector<32x512xf32>
    %cst_17 = arith.constant 0.000000e+00 : f32
    %82 = vector.broadcast %cst_17 : f32 to vector<32x512xf32>
    %83 = arith.maximumf %81, %82 : vector<32x512xf32>
    %c2_i32_18 = arith.constant 2 : i32
    %84 = tpu.dynamic_rotate %83 by %c2_i32_18 dim 1 : vector<32x512xf32>, i32 -> vector<32x512xf32>
    %cst_19 = arith.constant 0.000000e+00 : f32
    %85 = vector.shape_cast %14 : vector<1x512xi1> to vector<1x512xi1>
    %86 = vector.broadcast %85 : vector<1x512xi1> to vector<32x512xi1>
    %87 = vector.broadcast %cst_19 : f32 to vector<32x512xf32>
    %88 = arith.select %86, %84, %87 : vector<32x512xi1>, vector<32x512xf32>
    %c1_i32_20 = arith.constant 1 : i32
    %89 = tpu.dynamic_rotate %83 by %c1_i32_20 dim 1 : vector<32x512xf32>, i32 -> vector<32x512xf32>
    %cst_21 = arith.constant 0.000000e+00 : f32
    %90 = vector.shape_cast %19 : vector<1x512xi1> to vector<1x512xi1>
    %91 = vector.broadcast %90 : vector<1x512xi1> to vector<32x512xi1>
    %92 = vector.broadcast %cst_21 : f32 to vector<32x512xf32>
    %93 = arith.select %91, %89, %92 : vector<32x512xi1>, vector<32x512xf32>
    %c511_i32_22 = arith.constant 511 : i32
    %94 = tpu.dynamic_rotate %83 by %c511_i32_22 dim 1 : vector<32x512xf32>, i32 -> vector<32x512xf32>
    %cst_23 = arith.constant 0.000000e+00 : f32
    %95 = vector.shape_cast %24 : vector<1x512xi1> to vector<1x512xi1>
    %96 = vector.broadcast %95 : vector<1x512xi1> to vector<32x512xi1>
    %97 = vector.broadcast %cst_23 : f32 to vector<32x512xf32>
    %98 = arith.select %96, %94, %97 : vector<32x512xi1>, vector<32x512xf32>
    %c510_i32_24 = arith.constant 510 : i32
    %99 = tpu.dynamic_rotate %83 by %c510_i32_24 dim 1 : vector<32x512xf32>, i32 -> vector<32x512xf32>
    %cst_25 = arith.constant 0.000000e+00 : f32
    %100 = vector.shape_cast %29 : vector<1x512xi1> to vector<1x512xi1>
    %101 = vector.broadcast %100 : vector<1x512xi1> to vector<32x512xi1>
    %102 = vector.broadcast %cst_25 : f32 to vector<32x512xf32>
    %103 = arith.select %101, %99, %102 : vector<32x512xi1>, vector<32x512xf32>
    %104 = tpu.concatenate %88, %93, %83, %98, %103 in 0 : vector<32x512xf32>, vector<32x512xf32>, vector<32x512xf32>, vector<32x512xf32>, vector<32x512xf32> -> vector<160x512xf32>
    %c0_26 = arith.constant 0 : index
    %c0_27 = arith.constant 0 : index
    %105 = vector.load %arg4[%c0_26, %c0_27] : memref<32x160xbf16, #tpu.memory_space<vmem>>, vector<32x160xbf16>
    %106 = arith.truncf %104 : vector<160x512xf32> to vector<160x512xbf16>
    %cst_28 = arith.constant dense<0.000000e+00> : vector<32x512xf32>
    %107 = tpu.matmul %105, %106, %cst_28 {dimension_numbers = #tpu.dot_dimension_numbers<[1], [0], [0], [1], [0, 0, 1, 1], [], []>} : vector<32x160xbf16>, vector<160x512xbf16>, vector<32x512xf32> -> vector<32x512xf32>
    %c0_29 = arith.constant 0 : index
    %c0_30 = arith.constant 0 : index
    %108 = vector.load %arg5[%c0_29, %c0_30] : memref<32x1xf32, #tpu.memory_space<vmem>>, vector<32x1xf32>
    %109 = vector.broadcast %108 : vector<32x1xf32> to vector<32x512xf32>
    %110 = arith.addf %107, %109 : vector<32x512xf32>
    %cst_31 = arith.constant 0.000000e+00 : f32
    %111 = vector.broadcast %cst_31 : f32 to vector<32x512xf32>
    %112 = arith.maximumf %110, %111 : vector<32x512xf32>
    %c1_i32_32 = arith.constant 1 : i32
    %113 = tpu.dynamic_rotate %112 by %c1_i32_32 dim 1 : vector<32x512xf32>, i32 -> vector<32x512xf32>
    %cst_33 = arith.constant 0.000000e+00 : f32
    %114 = vector.shape_cast %19 : vector<1x512xi1> to vector<1x512xi1>
    %115 = vector.broadcast %114 : vector<1x512xi1> to vector<32x512xi1>
    %116 = vector.broadcast %cst_33 : f32 to vector<32x512xf32>
    %117 = arith.select %115, %113, %116 : vector<32x512xi1>, vector<32x512xf32>
    %c511_i32_34 = arith.constant 511 : i32
    %118 = tpu.dynamic_rotate %112 by %c511_i32_34 dim 1 : vector<32x512xf32>, i32 -> vector<32x512xf32>
    %cst_35 = arith.constant 0.000000e+00 : f32
    %119 = vector.shape_cast %24 : vector<1x512xi1> to vector<1x512xi1>
    %120 = vector.broadcast %119 : vector<1x512xi1> to vector<32x512xi1>
    %121 = vector.broadcast %cst_35 : f32 to vector<32x512xf32>
    %122 = arith.select %120, %118, %121 : vector<32x512xi1>, vector<32x512xf32>
    %123 = tpu.concatenate %117, %112, %122 in 0 : vector<32x512xf32>, vector<32x512xf32>, vector<32x512xf32> -> vector<96x512xf32>
    %c0_36 = arith.constant 0 : index
    %c0_37 = arith.constant 0 : index
    %124 = vector.load %arg6[%c0_36, %c0_37] : memref<32x96xbf16, #tpu.memory_space<vmem>>, vector<32x96xbf16>
    %125 = arith.truncf %123 : vector<96x512xf32> to vector<96x512xbf16>
    %cst_38 = arith.constant dense<0.000000e+00> : vector<32x512xf32>
    %126 = tpu.matmul %124, %125, %cst_38 {dimension_numbers = #tpu.dot_dimension_numbers<[1], [0], [0], [1], [0, 0, 1, 1], [], []>} : vector<32x96xbf16>, vector<96x512xbf16>, vector<32x512xf32> -> vector<32x512xf32>
    %c0_39 = arith.constant 0 : index
    %c0_40 = arith.constant 0 : index
    %127 = vector.load %arg7[%c0_39, %c0_40] : memref<32x1xf32, #tpu.memory_space<vmem>>, vector<32x1xf32>
    %128 = vector.broadcast %127 : vector<32x1xf32> to vector<32x512xf32>
    %129 = arith.addf %126, %128 : vector<32x512xf32>
    %cst_41 = arith.constant 0.000000e+00 : f32
    %130 = vector.broadcast %cst_41 : f32 to vector<32x512xf32>
    %131 = arith.maximumf %129, %130 : vector<32x512xf32>
    %c0_42 = arith.constant 0 : index
    %c0_43 = arith.constant 0 : index
    %132 = vector.load %arg8[%c0_42, %c0_43] : memref<32x16xbf16, #tpu.memory_space<vmem>>, vector<32x16xbf16>
    %133 = arith.truncf %1 : vector<16x512xf32> to vector<16x512xbf16>
    %cst_44 = arith.constant dense<0.000000e+00> : vector<32x512xf32>
    %134 = tpu.matmul %132, %133, %cst_44 {dimension_numbers = #tpu.dot_dimension_numbers<[1], [0], [0], [1], [0, 0, 1, 1], [], []>} : vector<32x16xbf16>, vector<16x512xbf16>, vector<32x512xf32> -> vector<32x512xf32>
    %c0_45 = arith.constant 0 : index
    %c0_46 = arith.constant 0 : index
    %135 = vector.load %arg9[%c0_45, %c0_46] : memref<32x1xf32, #tpu.memory_space<vmem>>, vector<32x1xf32>
    %136 = vector.broadcast %135 : vector<32x1xf32> to vector<32x512xf32>
    %137 = arith.addf %134, %136 : vector<32x512xf32>
    %138 = arith.addf %131, %137 : vector<32x512xf32>
    %c0_47 = arith.constant 0 : index
    %c0_48 = arith.constant 0 : index
    %c0_49 = arith.constant 0 : index
    %139 = vector.load %arg10[%c0_47, %c0_48, %c0_49] : memref<1x32x512xf32, #tpu.memory_space<vmem>>, vector<1x32x512xf32>
    %140 = vector.shape_cast %139 : vector<1x32x512xf32> to vector<32x512xf32>
    %141 = vector.shape_cast %138 : vector<32x512xf32> to vector<1x32x512xf32>
    tpu.vector_store %arg10[%c0_47, %c0_48, %c0_49], %141 {strides = array<i32>} : memref<1x32x512xf32, #tpu.memory_space<vmem>>, vector<1x32x512xf32>,
    return
  }
  func.func @transform_0(%arg0: i32) -> (i32, i32, i32) {
    %c0_i32 = arith.constant 0 : i32
    %c0_i32_0 = arith.constant 0 : i32
    %c0_i32_1 = arith.constant 0 : i32
    return %arg0, %c0_i32, %c0_i32_0 : i32, i32, i32
  }
  func.func @transform_1(%arg0: i32) -> (i32, i32) {
    %c0_i32 = arith.constant 0 : i32
    %c0_i32_0 = arith.constant 0 : i32
    %c0_i32_1 = arith.constant 0 : i32
    return %c0_i32, %c0_i32_0 : i32, i32
  }
  func.func @transform_2(%arg0: i32) -> (i32, i32) {
    %c0_i32 = arith.constant 0 : i32
    %c0_i32_0 = arith.constant 0 : i32
    %c0_i32_1 = arith.constant 0 : i32
    return %c0_i32, %c0_i32_0 : i32, i32
  }
  func.func @transform_3(%arg0: i32) -> (i32, i32) {
    %c0_i32 = arith.constant 0 : i32
    %c0_i32_0 = arith.constant 0 : i32
    %c0_i32_1 = arith.constant 0 : i32
    return %c0_i32, %c0_i32_0 : i32, i32
  }
  func.func @transform_4(%arg0: i32) -> (i32, i32) {
    %c0_i32 = arith.constant 0 : i32
    %c0_i32_0 = arith.constant 0 : i32
    %c0_i32_1 = arith.constant 0 : i32
    return %c0_i32, %c0_i32_0 : i32, i32
  }
  func.func @transform_5(%arg0: i32) -> (i32, i32) {
    %c0_i32 = arith.constant 0 : i32
    %c0_i32_0 = arith.constant 0 : i32
    %c0_i32_1 = arith.constant 0 : i32
    return %c0_i32, %c0_i32_0 : i32, i32
  }
  func.func @transform_6(%arg0: i32) -> (i32, i32) {
    %c0_i32 = arith.constant 0 : i32
    %c0_i32_0 = arith.constant 0 : i32
    %c0_i32_1 = arith.constant 0 : i32
    return %c0_i32, %c0_i32_0 : i32, i32
  }
  func.func @transform_7(%arg0: i32) -> (i32, i32) {
    %c0_i32 = arith.constant 0 : i32
    %c0_i32_0 = arith.constant 0 : i32
    %c0_i32_1 = arith.constant 0 : i32
    return %c0_i32, %c0_i32_0 : i32, i32
  }
  func.func @transform_8(%arg0: i32) -> (i32, i32) {
    %c0_i32 = arith.constant 0 : i32
    %c0_i32_0 = arith.constant 0 : i32
    %c0_i32_1 = arith.constant 0 : i32
    return %c0_i32, %c0_i32_0 : i32, i32
  }
  func.func @transform_9(%arg0: i32) -> (i32, i32, i32) {
    %c0_i32 = arith.constant 0 : i32
    %c0_i32_0 = arith.constant 0 : i32
    %c0_i32_1 = arith.constant 0 : i32
    return %arg0, %c0_i32, %c0_i32_0 : i32, i32, i32
  }
}

</mosaic_0001>

<bundles_post_ra>
// kernel: resnet_block_forward.1
= control target key start
LH: loop header
LB: loop body
LE: loop exit
PB: predicated region body
PF: predicated region fallthrough
CT: control target
= control target key end

     0   :  { %s2683_s30 = smov 0   ;;  %s3632_s0 = inlined_call_operand.vmem [shape: f32[2,16,512], index: 0, kind: input, shape index: {}]   ;;  %s3633_s1 = inlined_call_operand.vmem [shape: bf16[32,128], index: 1, kind: input, shape index: {}]   ;;  %s3634_s2 = inlined_call_operand.vmem [shape: f32[32,1], index: 2, kind: input, shape index: {}]   ;;  %s3635_s3 = inlined_call_operand.vmem [shape: bf16[32,160], index: 3, kind: input, shape index: {}]   ;;  %s3636_s4 = inlined_call_operand.vmem [shape: f32[32,1], index: 4, kind: input, shape index: {}]   ;;  %s3637_s5 = inlined_call_operand.vmem [shape: bf16[32,96], index: 5, kind: input, shape index: {}]   ;;  %s3638_s6 = inlined_call_operand.vmem [shape: f32[32,1], index: 6, kind: input, shape index: {}]   ;;  %s3639_s7 = inlined_call_operand.vmem [shape: bf16[32,16], index: 7, kind: input, shape index: {}]   ;;  %s3640_s8 = inlined_call_operand.vmem [shape: f32[32,1], index: 8, kind: input, shape index: {}]   ;;  %s3641_s9 = inlined_call_operand.vmem [shape: f32[2,32,512], index: 9, kind: output, shape index: {}]  }
   0x1 LB: > { %s1944_s10 = sadd.s32 4294967295, %s2623_s30   ;;  %p1948_p0 = scmp.ge.s32.totalorder %s2623_s30, 1  ;;  %s2623_s30 = sphi %s2683_s30, %s19_s30  }
   0x2   : > { %p287_p1 = scmp.lt.s32.totalorder %s2623_s30, 3 }
   0x4   : > { %p288_p2 = pnand %p1948_p0, %p287_p1 }
   0x6   : > { %291 = sbr.rel (%p288_p2) target bundleno = 1177 (0x499), region = 56 }
   0xb   : > { %p323_p3 = scmp.lt.s32.totalorder %s1944_s10, 1  ;;  %s2625_s15 = smov 124   ;;  %v3662_v16 = vmov 0   ;;  %v761_v17 = vld [vmem:[%s3634_s2 + $0x18] sm:$0xff]  ;;  %v760_v18 = vld [vmem:[%s3634_s2 + $0x10] sm:$0xff]  ;;  %v758_v19 = vld [vmem:[%s3634_s2] sm:$0xff]  ;;  %v342_v21 = vlaneseq }
   0xc   : > { %s2626_s16 = smov 125   ;;  %s2627_s17 = smov 126   ;;  %826 = vmatprep.mubr.bf16.mxu0 %v3662_v16  ;;  %879 = vmatprep.mubr.bf16.mxu1 %v3662_v16  ;;  %v759_v20 = vld [vmem:[%s3634_s2 + $0x8] sm:$0xff] }
   0xd   : > { %s3813_s10 = smov (!%p323_p3, %s1944_s10), 1  ;;  %s2628_s18 = smov 127   ;;  %2363 = vset.pattern.permute.xlu0 %v3662_v16  ;;  %2364 = vset.pattern.permute.xlu1 %v3662_v16  ;;  %v2737_v22 = vand.u32 127, %v342_v21 }
   0xe   : > { %s2205_s11 = sshll.u32 %s3813_s10, 6  ;;  %s2629_s19 = smov 1  }
   0xf   : > { %s327_s14 = scalar_lea.vmem %s3632_s0, %s2205_s11  ;;  %s2630_s20 = smov 2   ;;  %v344_v23 = vadd.s32 128, %v2737_v22  ;;  %v346_v24 = vadd.s32 384, %v2737_v22  ;;  %v345_v25 = vadd.s32 256, %v2737_v22  ;;  %vm427_vm0 = vcmp.lt.s32.totalorder %v2737_v22, 124 }
  0x10   : > { %v336_v0 = vld [vmem:[%s327_s14 + $0x10] sm:$0xff]  ;;  %v334_v2 = vld [vmem:[%s327_s14] sm:$0xff]  ;;  %v337_v5 = vld [vmem:[%s327_s14 + $0x18] sm:$0xff]  ;;  %s2632_s21 = smov 3   ;;  %vm415_vm8 = vcmp.lt.s32.totalorder %v2737_v22, 125 }
  0x11   : > { %v340_v1 = vld [vmem:[%s327_s14 + $0x30] sm:$0xff]  ;;  %v338_v4 = vld [vmem:[%s327_s14 + $0x20] sm:$0xff]  ;;  %v341_v6 = vld [vmem:[%s327_s14 + $0x38] sm:$0xff]  ;;  %v2742_v27 = vand.u32 127, %v344_v23  ;;  %v2744_v28 = vand.u32 127, %v346_v24  ;;  %v2746_v30 = vand.u32 127, %v345_v25 }
  0x12   : > { %v2233_v3 = vpack.i.bf16 %v340_v1, %v336_v0  ;;  %v2223_v7 = vpack.i.bf16 %v338_v4, %v334_v2  ;;  %v335_v8 = vld [vmem:[%s327_s14 + $0x8] sm:$0xff]  ;;  %v2238_v10 = vpack.i.bf16 %v341_v6, %v337_v5  ;;  %v2704_v13 = vpack.c.bf16 %v341_v6, %v337_v5  ;;  %vm2754_vm3 = vmpackc.low %vm427_vm0, %vm427_vm0 }
  0x13   : > { %v339_v9 = vld [vmem:[%s327_s14 + $0x28] sm:$0xff]  ;;  %v2707_v14 = vpack.c.bf16 %v338_v4, %v334_v2  ;;  %v2709_v15 = vpack.c.bf16 %v340_v1, %v336_v0  ;;  %vm428_vm1 = vcmp.lt.s32.totalorder %v2742_v27, 124  ;;  %vm430_vm2 = vcmp.lt.s32.totalorder %v2744_v28, 124  ;;  %vm1964_vm15 = vmpackc.low %vm415_vm8, %vm415_vm8 }
  0x14   : > { %2234 = vrot.lane.b32.xlu1 %v2233_v3, %s2625_s15  ;;  %2224 = vrot.lane.b32.xlu0 %v2223_v7, %s2625_s15  ;;  %v2228_v11 = vpack.i.bf16 %v339_v9, %v335_v8  ;;  %v2702_v12 = vpack.c.bf16 %v339_v9, %v335_v8  ;;  %vm429_vm4 = vcmp.lt.s32.totalorder %v2746_v30, 124  ;;  %vm1997_vm5 = vmpackc.low %vm430_vm2, %vm430_vm2  ;;  %vm418_vm9 = vcmp.lt.s32.totalorder %v2744_v28, 125 }
  0x15   : > { %3667 = vst [vmem:[#allocation2_spill] sm:$0xff] %v2707_v14  ;;  %3668 = vst [vmem:[#allocation3_spill] sm:$0xff] %v2709_v15  ;;  %vm417_vm10 = vcmp.lt.s32.totalorder %v2746_v30, 125  ;;  %vm416_vm11 = vcmp.lt.s32.totalorder %v2742_v27, 125  ;;  %vm405_vm2 = vcmp.lt.s32.totalorder %v2746_v30, 126 }
  0x16   : > { %vm1955_vm6 = vmpackc.low %vm428_vm1, %vm428_vm1  ;;  %vm406_vm1 = vcmp.lt.s32.totalorder %v2744_v28, 126 }
  0x17   : > { %vm2000_vm7 = vmpackc.low %vm429_vm4, %vm429_vm4 }
  0x18   : > { %2239 = vrot.lane.b32.xlu1 %v2238_v10, %s2625_s15  ;;  %2229 = vrot.lane.b32.xlu0 %v2228_v11, %s2625_s15  ;;  %vm2003_vm12 = vmpackc.low %vm418_vm9, %vm418_vm9  ;;  %vm394_vm9 = vcmp.lt.s32.totalorder %v2744_v28, 127 }
  0x19   : > { %vm2006_vm13 = vmpackc.low %vm417_vm10, %vm417_vm10  ;;  %vm393_vm10 = vcmp.lt.s32.totalorder %v2746_v30, 127 }
  0x1a   : > { %vm1961_vm14 = vmpackc.low %vm416_vm11, %vm416_vm11  ;;  %vm3644_vm11 = vcmp.lt.s32.totalorder %v2737_v22, 1 }
  0x1b   : > { %vm2815_vm4 = vmpackc.low %vm406_vm1, %vm406_vm1 }
  0x1c   : > { %2249 = vrot.lane.b32.xlu1 %v2228_v11, %s2626_s16  ;;  %2244 = vrot.lane.b32.xlu0 %v2223_v7, %s2626_s16 }
  0x20   : > { %2259 = vrot.lane.b32.xlu1 %v2238_v10, %s2626_s16  ;;  %2254 = vrot.lane.b32.xlu0 %v2233_v3, %s2626_s16 }
  0x24   : > { %2269 = vrot.lane.b32.xlu1 %v2228_v11, %s2627_s17  ;;  %2264 = vrot.lane.b32.xlu0 %v2223_v7, %s2627_s17 }
  0x28   : > { %2279 = vrot.lane.b32.xlu1 %v2238_v10, %s2627_s17  ;;  %2274 = vrot.lane.b32.xlu0 %v2233_v3, %s2627_s17 }
  0x2c   : > { %2289 = vrot.lane.b32.xlu1 %v2228_v11, %s2628_s18  ;;  %2284 = vrot.lane.b32.xlu0 %v2223_v7, %s2628_s18 }
  0x30   : > { %2299 = vrot.lane.b32.xlu1 %v2238_v10, %s2628_s18  ;;  %2294 = vrot.lane.b32.xlu0 %v2233_v3, %s2628_s18 }
  0x34   : > { %2309 = vrot.lane.b32.xlu1 %v2228_v11, %s2629_s19  ;;  %2304 = vrot.lane.b32.xlu0 %v2223_v7, %s2629_s19 }
  0x38   : > { %2319 = vrot.lane.b32.xlu1 %v2238_v10, %s2629_s19  ;;  %2314 = vrot.lane.b32.xlu0 %v2233_v3, %s2629_s19 }
  0x3c   : > { %2329 = vrot.lane.b32.xlu1 %v2228_v11, %s2630_s20  ;;  %2324 = vrot.lane.b32.xlu0 %v2223_v7, %s2630_s20 }
  0x40   : > { %2339 = vrot.lane.b32.xlu1 %v2238_v10, %s2630_s20  ;;  %2334 = vrot.lane.b32.xlu0 %v2233_v3, %s2630_s20 }
  0x44   : > { %2349 = vrot.lane.b32.xlu1 %v2228_v11, %s2632_s21  ;;  %2344 = vrot.lane.b32.xlu0 %v2223_v7, %s2632_s21 }
  0x48   : > { %2359 = vrot.lane.b32.xlu1 %v2238_v10, %s2632_s21  ;;  %2354 = vrot.lane.b32.xlu0 %v2233_v3, %s2632_s21  ;;  %s2206_s21 = sshll.u32 %s3813_s10, 7 }
  0x4c   : > { %779 = vperm.xlu1 %2364, %v761_v17   ;;  %774 = vperm.xlu0 %2363, %v760_v18  }
  0x50   : > { %764 = vperm.xlu1 %2364, %v758_v19   ;;  %769 = vperm.xlu0 %2363, %v759_v20  }
  0x86   : > { %v2235_v26 = vpop.permute.xlu1 %2234  ;;  %v2225_v29 = vpop.permute.xlu0 %2224 }
  0x87   : > { %v2227_v31 = vunpack.i.h.bf16 %v2225_v29  ;;  %v2226_v32 = vunpack.i.l.bf16 %v2225_v29  ;;  %v2237_v34 = vunpack.i.h.bf16 %v2235_v26  ;;  %v2236_v35 = vunpack.i.l.bf16 %v2235_v26 }
  0x8a   : > { %v2240_v33 = vpop.permute.xlu1 %2239  ;;  %v2230_v38 = vpop.permute.xlu0 %2229 }
  0x8b   : > { %v2242_v36 = vunpack.i.h.bf16 %v2240_v33  ;;  %v2241_v37 = vunpack.i.l.bf16 %v2240_v33  ;;  %v2232_v39 = vunpack.i.h.bf16 %v2230_v38  ;;  %v2231_v40 = vunpack.i.l.bf16 %v2230_v38 }
  0x8d   : > { %v704_v42 = vsel %vm427_vm0, %v2241_v37, %v2226_v32  ;;  %v705_v43 = vsel %vm427_vm0, %v2242_v36, %v2227_v31  ;;  %v698_v44 = vsel %vm427_vm0, %v2236_v35, %v2241_v37  ;;  %v699_v45 = vsel %vm427_vm0, %v2237_v34, %v2242_v36 }
  0x8e   : > { %v2250_v46 = vpop.permute.xlu1 %2249  ;;  %v700_v47 = vsel %vm427_vm0, %v2231_v40, %v2236_v35  ;;  %v701_v48 = vsel %vm427_vm0, %v2232_v39, %v2237_v34  ;;  %v1998_v49 = vpack.c.bf16 %v705_v43, %v704_v42  ;;  %v702_v50 = vsel %vm427_vm0, %v2226_v32, %v2231_v40  ;;  %v2245_v51 = vpop.permute.xlu0 %2244 }
  0x8f   : > { %v1956_v52 = vpack.c.bf16 %v701_v48, %v700_v47  ;;  %v703_v53 = vsel %vm427_vm0, %v2227_v31, %v2232_v39  ;;  %v2001_v55 = vpack.c.bf16 %v699_v45, %v698_v44  ;;  %v2252_v56 = vunpack.i.h.bf16 %v2250_v46 }
  0x90   : > { %1999 = vmatprep.subr.msk.bf16.mxu1 %vm1997_vm5, %v1998_v49  ;;  %v1959_v54 = vpack.c.bf16 %v703_v53, %v702_v50  ;;  %v2251_v57 = vunpack.i.l.bf16 %v2250_v46  ;;  %v2247_v58 = vunpack.i.h.bf16 %v2245_v51  ;;  %v2246_v59 = vunpack.i.l.bf16 %v2245_v51  ;;  %vm2825_vm5 = vmpackc.low %vm405_vm2, %vm405_vm2 }
  0x91   : > { %1957 = vmatprep.subr.msk.bf16.mxu0 %vm1955_vm6, %v1956_v52  ;;  %2002 = vmatpush1.bf16.msk.msra.mxu1 %vm2000_vm7, %v2001_v55  ;;  %vm3642_vm0 = vcmp.lt.s32.totalorder %v2737_v22, 126  ;;  %v3671_v39 = vmov 0  ;;  %v3673_v45 = vmov 0  ;;  %v3675_v49 = vmov 0 }
  0x92   : > { %1960 = vmatpush1.bf16.msk.msra.mxu0 %vm2754_vm3, %v1959_v54  ;;  %v2260_v60 = vpop.permute.xlu1 %2259  ;;  %v2255_v63 = vpop.permute.xlu0 %2254  ;;  %v662_v2 = vsel %vm415_vm8, %v2247_v58, %v2252_v56  ;;  %v661_v3 = vsel %vm415_vm8, %v2246_v59, %v2251_v57  ;;  %vm404_vm3 = vcmp.lt.s32.totalorder %v2742_v27, 126  ;;  %v3672_v39 = vsel %vm2815_vm4, 4294967295, %v3671_v39  ;;  %vm2840_vm7 = vmpackc.low %vm3642_vm0, %vm3642_vm0 }
  0x93   : > { %v2262_v61 = vunpack.i.h.bf16 %v2260_v60  ;;  %v2261_v62 = vunpack.i.l.bf16 %v2260_v60  ;;  %v2257_v0 = vunpack.i.h.bf16 %v2255_v63  ;;  %v2256_v1 = vunpack.i.l.bf16 %v2255_v63  ;;  %vm2831_vm6 = vmpackc.low %vm404_vm3, %vm404_vm3 }
  0x94   : > { %v1965_v19 = vpack.c.bf16 %v662_v2, %v661_v3  ;;  %v3674_v45 = vsel %vm2825_vm5, 4294967295, %v3673_v45  ;;  %v3676_v49 = vsel %vm2831_vm6, 4294967295, %v3675_v49  ;;  %v3677_v52 = vmov 0 }
  0x95   : > { %v663_v4 = vsel %vm415_vm8, %v2261_v62, %v2246_v59  ;;  %v664_v5 = vsel %vm415_vm8, %v2262_v61, %v2247_v58  ;;  %v658_v7 = vsel %vm415_vm8, %v2257_v0, %v2262_v61  ;;  %v660_v8 = vsel %vm415_vm8, %v2252_v56, %v2257_v0 }
  0x96   : > { %v2004_v6 = vpack.c.bf16 %v664_v5, %v663_v4  ;;  %v657_v9 = vsel %vm415_vm8, %v2256_v1, %v2261_v62  ;;  %v2270_v10 = vpop.permute.xlu1 %2269  ;;  %v659_v11 = vsel %vm415_vm8, %v2251_v57, %v2256_v1  ;;  %v2265_v18 = vpop.permute.xlu0 %2264  ;;  %v3678_v52 = vsel %vm2840_vm7, 4294967295, %v3677_v52 }
  0x97   : > { %v2007_v17 = vpack.c.bf16 %v658_v7, %v657_v9  ;;  %v1962_v20 = vpack.c.bf16 %v660_v8, %v659_v11  ;;  %v2272_v21 = vunpack.i.h.bf16 %v2270_v10  ;;  %v2271_v23 = vunpack.i.l.bf16 %v2270_v10 }
  0x98   : > { %2005 = vmatprep.subr.msk.bf16.mxu1 %vm2003_vm12, %v2004_v6  ;;  %v2267_v24 = vunpack.i.h.bf16 %v2265_v18  ;;  %v2266_v25 = vunpack.i.l.bf16 %v2265_v18  ;;  %vm3643_vm8 = vcmp.lt.s32.totalorder %v2737_v22, 127  ;;  %vm392_vm12 = vcmp.lt.s32.totalorder %v2742_v27, 127 }
  0x99   : > { %2008 = vmatpush1.bf16.msk.msra.mxu1 %vm2006_vm13, %v2007_v17  ;;  %1963 = vmatprep.subr.msk.bf16.mxu0 %vm1961_vm14, %v1962_v20  ;;  %vm2863_vm13 = vmpackc.low %vm394_vm9, %vm394_vm9  ;;  %vm376_vm2 = vcmp.ge.s32.totalorder %v2742_v27, 1  ;;  %vm3645_vm3 = vcmp.lt.s32.totalorder %v2737_v22, 2  ;;  %vm378_vm9 = vcmp.ge.s32.totalorder %v2744_v28, 1 }
  0x9a   : > { %v2280_v26 = vpop.permute.xlu1 %2279  ;;  %1966 = vmatpush1.bf16.msk.msra.mxu0 %vm1964_vm15, %v1965_v19  ;;  %v2275_v32 = vpop.permute.xlu0 %2274  ;;  %v621_v35 = vsel %vm3642_vm0, %v2267_v24, %v2272_v21  ;;  %v620_v36 = vsel %vm3642_vm0, %v2266_v25, %v2271_v23  ;;  %vm2873_vm14 = vmpackc.low %vm393_vm10, %vm393_vm10  ;;  %vm375_vm10 = vcmp.ge.s32.totalorder %v2737_v22, 1 }
  0x9b   : > { %v2282_v29 = vunpack.i.h.bf16 %v2280_v26  ;;  %v2281_v31 = vunpack.i.l.bf16 %v2280_v26  ;;  %v2277_v33 = vunpack.i.h.bf16 %v2275_v32  ;;  %v2276_v34 = vunpack.i.l.bf16 %v2275_v32  ;;  %vm2882_vm15 = vmpackc.low %vm392_vm12, %vm392_vm12 }
  0x9c   : > { %v1971_v50 = vpack.c.bf16 %v621_v35, %v620_v36  ;;  %vm2891_vm1 = vmpackc.low %vm3643_vm8, %vm3643_vm8  ;;  %vm377_vm12 = vcmp.ge.s32.totalorder %v2746_v30, 1 }
  0x9d   : > { %v622_v37 = vsel %vm3642_vm0, %v2281_v31, %v2266_v25  ;;  %v623_v38 = vsel %vm3642_vm0, %v2282_v29, %v2267_v24  ;;  %v617_v41 = vsel %vm3642_vm0, %v2277_v33, %v2282_v29  ;;  %v619_v42 = vsel %vm3642_vm0, %v2272_v21, %v2277_v33 }
  0x9e   : > { %v2010_v40 = vpack.c.bf16 %v623_v38, %v622_v37  ;;  %v616_v43 = vsel %vm3642_vm0, %v2276_v34, %v2281_v31  ;;  %v2290_v44 = vpop.permute.xlu1 %2289  ;;  %v618_v46 = vsel %vm3642_vm0, %v2271_v23, %v2276_v34  ;;  %v2285_v48 = vpop.permute.xlu0 %2284  ;;  %vm2920_vm0 = vmpackc.low %vm376_vm2, %vm376_vm2 }
  0x9f   : > { %v2013_v47 = vpack.c.bf16 %v617_v41, %v616_v43  ;;  %v1968_v51 = vpack.c.bf16 %v619_v42, %v618_v46  ;;  %v2292_v53 = vunpack.i.h.bf16 %v2290_v44  ;;  %v2291_v54 = vunpack.i.l.bf16 %v2290_v44  ;;  %vm2934_vm2 = vmpackc.low %vm378_vm9, %vm378_vm9  ;;  %v3811_v42 = vld [vmem:[#allocation3_spill] sm:$0xff] }
  0xa0   : > { %2011 = vmatprep.subr.msk.bf16.mxu1 %vm2815_vm4, %v2010_v40  ;;  %v2287_v55 = vunpack.i.h.bf16 %v2285_v48  ;;  %v2286_v56 = vunpack.i.l.bf16 %v2285_v48  ;;  %vm2953_vm9 = vmpackc.low %vm375_vm10, %vm375_vm10 }
  0xa1   : > { %2014 = vmatpush1.bf16.msk.msra.mxu1 %vm2825_vm5, %v2013_v47  ;;  %1969 = vmatprep.subr.msk.bf16.mxu0 %vm2831_vm6, %v1968_v51 }
  0xa2   : > { %v2300_v57 = vpop.permute.xlu1 %2299  ;;  %1972 = vmatpush1.bf16.msk.msra.mxu0 %vm2840_vm7, %v1971_v50  ;;  %v2295_v60 = vpop.permute.xlu0 %2294  ;;  %v580_v63 = vsel %vm3643_vm8, %v2287_v55, %v2292_v53  ;;  %v579_v0 = vsel %vm3643_vm8, %v2286_v56, %v2291_v54  ;;  %vm451_vm7 = vcmp.lt.s32.totalorder %v2737_v22, 3  ;;  %v2614_v50 = vld [vmem:[%s3637_s5 + $0x8] sm:$0xff]  }
  0xa3   : > { %v2302_v58 = vunpack.i.h.bf16 %v2300_v57  ;;  %v2301_v59 = vunpack.i.l.bf16 %v2300_v57  ;;  %v2297_v61 = vunpack.i.h.bf16 %v2295_v60  ;;  %v2296_v62 = vunpack.i.l.bf16 %v2295_v60 }
  0xa4   : > { %v1977_v26 = vpack.c.bf16 %v580_v63, %v579_v0  ;;  %v3691_v57 = vmov 0 }
  0xa5   : > { %v581_v1 = vsel %vm3643_vm8, %v2301_v59, %v2286_v56  ;;  %v582_v2 = vsel %vm3643_vm8, %v2302_v58, %v2287_v55  ;;  %v576_v5 = vsel %vm3643_vm8, %v2297_v61, %v2302_v58  ;;  %v578_v6 = vsel %vm3643_vm8, %v2292_v53, %v2297_v61 }
  0xa6   : > { %v2016_v4 = vpack.c.bf16 %v582_v2, %v581_v1  ;;  %v575_v7 = vsel %vm3643_vm8, %v2296_v62, %v2301_v59  ;;  %v2310_v8 = vpop.permute.xlu1 %2309  ;;  %v577_v10 = vsel %vm3643_vm8, %v2291_v54, %v2296_v62  ;;  %v2305_v19 = vpop.permute.xlu0 %2304  ;;  %vm2944_vm8 = vmpackc.low %vm377_vm12, %vm377_vm12  ;;  %vm3695_vm12 = vcmp.ge.s32.totalorder %v2742_v27, 2 }
  0xa7   : > { %v2019_v11 = vpack.c.bf16 %v576_v5, %v575_v7  ;;  %v2312_v17 = vunpack.i.h.bf16 %v2310_v8  ;;  %v2311_v18 = vunpack.i.l.bf16 %v2310_v8  ;;  %v1974_v21 = vpack.c.bf16 %v578_v6, %v577_v10  ;;  %vm2968_vm10 = vmpackc.low %vm3695_vm12, %vm3695_vm12 }
  0xa8   : > { %v2307_v23 = vunpack.i.h.bf16 %v2305_v19  ;;  %v2306_v24 = vunpack.i.l.bf16 %v2305_v19  ;;  %2017 = vmatprep.subr.msk.bf16.mxu1 %vm2863_vm13, %v2016_v4  ;;  %v3692_v57 = vsel %vm2944_vm8, 4294967295, %v3691_v57  ;;  %v3696_v1 = vmov 0 }
  0xa9   : > { %2020 = vmatpush1.bf16.msk.msra.mxu1 %vm2873_vm14, %v2019_v11  ;;  %1975 = vmatprep.subr.msk.bf16.mxu0 %vm2882_vm15, %v1974_v21  ;;  %v3697_v1 = vsel %vm2968_vm10, 4294967295, %v3696_v1  ;;  %vm3698_vm12 = vcmp.lt.s32.totalorder %v2737_v22, 2 }
  0xaa   : > { %v539_v29 = vsel %vm3644_vm11, %v2307_v23, %v2312_v17  ;;  %v538_v31 = vsel %vm3644_vm11, %v2306_v24, %v2311_v18  ;;  %v2320_v32 = vpop.permute.xlu1 %2319  ;;  %855 = vmatprep.subr.bf16.mxu1 %v2704_v13  ;;  %1978 = vmatpush1.bf16.msk.msra.mxu0 %vm2891_vm1, %v1977_v26  ;;  %v2315_v35 = vpop.permute.xlu0 %2314  ;;  %vm3699_vm4 = vmmov %vm3698_vm12  ;;  %v3704_v26 = vmov 0 }
  0xab   : > { %v2322_v33 = vunpack.i.h.bf16 %v2320_v32  ;;  %v2321_v34 = vunpack.i.l.bf16 %v2320_v32  ;;  %v2317_v36 = vunpack.i.h.bf16 %v2315_v35  ;;  %v2316_v37 = vunpack.i.l.bf16 %v2315_v35  ;;  %802 = vmatprep.subr.bf16.mxu0 %v2702_v12  ;;  %vm3702_vm5 = vmmov %vm3699_vm4 }
  0xac   : > { %v1980_v38 = vpack.c.bf16 %v539_v29, %v538_v31  ;;  %v3708_v35 = vmov 0 }
  0xad   : > { %v540_v40 = vsel %vm3644_vm11, %v2321_v34, %v2306_v24  ;;  %v541_v41 = vsel %vm3644_vm11, %v2322_v33, %v2307_v23  ;;  %856 = vmatpush1.bf16.msra.mxu1 %v2709_v15  ;;  %v535_v44 = vsel %vm3644_vm11, %v2317_v36, %v2322_v33  ;;  %v537_v46 = vsel %vm3644_vm11, %v2312_v17, %v2317_v36 }
  0xae   : > { %v1983_v43 = vpack.c.bf16 %v541_v41, %v540_v40  ;;  %v534_v47 = vsel %vm3644_vm11, %v2316_v37, %v2321_v34  ;;  %v2330_v48 = vpop.permute.xlu1 %2329  ;;  %v536_v51 = vsel %vm3644_vm11, %v2311_v18, %v2316_v37  ;;  %803 = vmatpush1.bf16.msra.mxu0 %v2707_v14  ;;  %v2325_v56 = vpop.permute.xlu0 %2324  ;;  %vm363_vm11 = vcmp.ge.s32.totalorder %v2737_v22, 2 }
  0xaf   : > { %v2022_v53 = vpack.c.bf16 %v535_v44, %v534_v47  ;;  %v2332_v54 = vunpack.i.h.bf16 %v2330_v48  ;;  %v2331_v55 = vunpack.i.l.bf16 %v2330_v48  ;;  %v2025_v58 = vpack.c.bf16 %v537_v46, %v536_v51  ;;  %1981 = vmatprep.subr.msk.bf16.mxu0 %vm2920_vm0, %v1980_v38  ;;  %vm2984_vm6 = vmpackc.low %vm363_vm11, %vm363_vm11 }
  0xb0   : > { %v2327_v59 = vunpack.i.h.bf16 %v2325_v56  ;;  %v2326_v60 = vunpack.i.l.bf16 %v2325_v56  ;;  %vm3706_vm11 = vmmov %vm3699_vm4 }
  0xb1   : > { %2023 = vmatprep.subr.msk.bf16.mxu1 %vm2934_vm2, %v2022_v53 }
  0xb2   : > { %v498_v62 = vsel %vm3645_vm3, %v2327_v59, %v2332_v54  ;;  %v497_v63 = vsel %vm3645_vm3, %v2326_v60, %v2331_v55  ;;  %2026 = vmatpush1.bf16.msk.msra.mxu1 %vm2944_vm8, %v2025_v58  ;;  %v2340_v0 = vpop.permute.xlu1 %2339  ;;  %1984 = vmatpush1.bf16.msk.msra.mxu0 %vm2953_vm9, %v1983_v43  ;;  %v2335_v6 = vpop.permute.xlu0 %2334  ;;  %vm366_vm3 = vcmp.ge.s32.totalorder %v2744_v28, 2 }
  0xb3   : > { %v1986_v2 = vpack.c.bf16 %v498_v62, %v497_v63  ;;  %v2342_v4 = vunpack.i.h.bf16 %v2340_v0  ;;  %v2341_v5 = vunpack.i.l.bf16 %v2340_v0  ;;  %v2337_v7 = vunpack.i.h.bf16 %v2335_v6  ;;  %v2606_v63 = vld [vmem:[%s3633_s1 + $0x8] sm:$0xff]  }
  0xb4   : > { %v2336_v8 = vunpack.i.l.bf16 %v2335_v6 }
  0xb5   : > { %v499_v10 = vsel %vm3698_vm12, %v2341_v5, %v2326_v60  ;;  %v500_v11 = vsel %vm3699_vm4, %v2342_v4, %v2327_v59  ;;  %1987 = vmatprep.subr.msk.bf16.mxu0 %vm2968_vm10, %v1986_v2  ;;  %v494_v19 = vsel %vm3702_vm5, %v2337_v7, %v2342_v4  ;;  %vm3703_vm12 = vmmov %vm3699_vm4  ;;  %vm3707_vm5 = vcmp.ge.s32.totalorder %v2746_v30, 2  ;;  %v2605_v60 = vld [vmem:[%s3633_s1] sm:$0xff]  }
  0xb6   : > { %v1989_v18 = vpack.c.bf16 %v500_v11, %v499_v10  ;;  %v496_v21 = vsel %vm3703_vm12, %v2332_v54, %v2337_v7  ;;  %v493_v23 = vsel %vm3699_vm4, %v2336_v8, %v2341_v5  ;;  %v2350_v24 = vpop.permute.xlu1 %2349  ;;  %vm2995_vm10 = vmpackc.low %vm366_vm3, %vm366_vm3  ;;  %v495_v29 = vsel %vm3706_vm11, %v2331_v55, %v2336_v8  ;;  %v2345_v34 = vpop.permute.xlu0 %2344 }
  0xb7   : > { %v3705_v26 = vsel %vm2995_vm10, 4294967295, %v3704_v26  ;;  %v2028_v31 = vpack.c.bf16 %v494_v19, %v493_v23  ;;  %v2352_v32 = vunpack.i.h.bf16 %v2350_v24  ;;  %v2351_v33 = vunpack.i.l.bf16 %v2350_v24  ;;  %vm3004_vm8 = vmpackc.low %vm3707_vm5, %vm3707_vm5 }
  0xb8   : > { %v3709_v35 = vsel %vm3004_vm8, 4294967295, %v3708_v35  ;;  %v2031_v36 = vpack.c.bf16 %v496_v21, %v495_v29  ;;  %v2347_v37 = vunpack.i.h.bf16 %v2345_v34  ;;  %v2346_v38 = vunpack.i.l.bf16 %v2345_v34  ;;  %1990 = vmatpush1.bf16.msk.msra.mxu0 %vm2984_vm6, %v1989_v18 }
  0xb9   : > { %2029 = vmatprep.subr.msk.bf16.mxu1 %vm2995_vm10, %v2028_v31  ;;  %vm3710_vm3 = vcmp.ge.s32.totalorder %v2742_v27, 3  ;;  %vm351_vm4 = vcmp.ge.s32.totalorder %v2737_v22, 3  ;;  %vm354_vm11 = vcmp.ge.s32.totalorder %v2744_v28, 3  ;;  %vm353_vm5 = vcmp.ge.s32.totalorder %v2746_v30, 3 }
  0xba   : > { %v457_v40 = vsel %vm451_vm7, %v2347_v37, %v2352_v32  ;;  %v456_v41 = vsel %vm451_vm7, %v2346_v38, %v2351_v33  ;;  %2032 = vmatpush1.bf16.msk.msra.mxu1 %vm3004_vm8, %v2031_v36  ;;  %v2360_v43 = vpop.permute.xlu1 %2359  ;;  %vm1991_vm12 = vmpackc.low %vm3710_vm3, %vm3710_vm3  ;;  %v2355_v48 = vpop.permute.xlu0 %2354 }
  0xbb   : > { %v1992_v44 = vpack.c.bf16 %v457_v40, %v456_v41  ;;  %v2362_v46 = vunpack.i.h.bf16 %v2360_v43  ;;  %v2361_v47 = vunpack.i.l.bf16 %v2360_v43  ;;  %v2357_v51 = vunpack.i.h.bf16 %v2355_v48  ;;  %vm1994_vm3 = vmpackc.low %vm351_vm4, %vm351_vm4 }
  0xbc   : > { %v2356_v53 = vunpack.i.l.bf16 %v2355_v48  ;;  %vm2033_vm8 = vmpackc.low %vm354_vm11, %vm354_vm11 }
  0xbd   : > { %v458_v54 = vsel %vm451_vm7, %v2361_v47, %v2346_v38  ;;  %v459_v27 = vsel %vm451_vm7, %v2362_v46, %v2347_v37  ;;  %1993 = vmatprep.subr.msk.bf16.mxu0 %vm1991_vm12, %v1992_v44  ;;  %v453_v56 = vsel %vm451_vm7, %v2357_v51, %v2362_v46  ;;  %v455_v58 = vsel %vm451_vm7, %v2352_v32, %v2357_v51  ;;  %vm2036_vm10 = vmpackc.low %vm353_vm5, %vm353_vm5 }
  0xbe   : > { %v1995_v55 = vpack.c.bf16 %v459_v27, %v458_v54  ;;  %v452_v28 = vsel %vm451_vm7, %v2356_v53, %v2361_v47  ;;  %v454_v30 = vsel %vm451_vm7, %v2351_v33, %v2356_v53  ;;  %vm3666_vm7 = vcmask 261120  }
  0xbf   : > { %v2034_v59 = vpack.c.bf16 %v453_v56, %v452_v28  ;;  %v2037_v62 = vpack.c.bf16 %v455_v58, %v454_v30 }
  0xc0   : > { %1996 = vmatpush1.bf16.msk.msra.mxu0 %vm1994_vm3, %v1995_v55 }
  0xc1   : > { %2035 = vmatprep.subr.msk.bf16.mxu1 %vm2033_vm8, %v2034_v59  ;;  %vm3711_vm8 = vcmp.lt.s32.totalorder %v2737_v22, 127 }
  0xc2   : > { %2038 = vmatpush1.bf16.msk.msra.mxu1 %vm2036_vm10, %v2037_v62  ;;  %vm3712_vm10 = vmmov %vm3711_vm8 }
  0xc3   : > { %827 = vmatmul.mubr.bf16.vlgmr.msra.gmra.mxu0 %v2605_v60  ;;  %vm3713_vm12 = vmmov %vm3711_vm8 }
  0xc4   : > { %836 = vmatprep.mubr.bf16.mxu0 %v3662_v16  ;;  %vm3714_vm4 = vmmov %vm3711_vm8 }
  0xc5   : > { %880 = vmatmul.mubr.bf16.vlgmr.msra.gmra.mxu1 %v2605_v60  ;;  %vm3715_vm11 = vmmov %vm3714_vm4 }
  0xc6   : > { %889 = vmatprep.mubr.bf16.mxu1 %v3662_v16  ;;  %vm3716_vm5 = vmmov %vm3714_vm4 }
  0xc7   : > { %v780_v0 = vpop.permute.xlu1 %779  ;;  %v775_v2 = vpop.permute.xlu0 %774  ;;  %vm3717_vm3 = vmmov %vm3714_vm4 }
  0xcb   : > { %837 = vmatmul.mubr.bf16.gmra.mxu0 %v2606_v63  ;;  %v765_v5 = vpop.permute.xlu1 %764  ;;  %v770_v8 = vpop.permute.xlu0 %769 }
  0xcd   : > { %890 = vmatmul.mubr.bf16.gmra.mxu1 %v2606_v63 }
 0x183   : > { %v828_v4 = vpop.f32.mrf.mxu0 }
 0x184   : > { %v829_v10 = vadd.f32 %v828_v4, %v765_v5 }
 0x185   : > { %v881_v6 = vpop.f32.mrf.mxu1  ;;  %v830_v7 = vpop.f32.mrf.mxu0 }
 0x186   : > { %v831_v21 = vadd.f32 %v830_v7, %v765_v5  ;;  %v900_v33 = vmax.f32 %v829_v10, 0.0  ;;  %v882_v34 = vadd.f32 %v881_v6, %v765_v5 }
 0x187   : > { %v883_v11 = vpop.f32.mrf.mxu1  ;;  %v832_v18 = vpop.f32.mrf.mxu0 }
 0x188   : > { %v833_v19 = vadd.f32 %v832_v18, %v770_v8  ;;  %v901_v41 = vmax.f32 %v831_v21, 0.0  ;;  %v884_v43 = vadd.f32 %v883_v11, %v765_v5  ;;  %v902_v51 = vmax.f32 %v882_v34, 0.0 }
 0x189   : > { %v885_v23 = vpop.f32.mrf.mxu1  ;;  %v834_v24 = vpop.f32.mrf.mxu0 }
 0x18a   : > { %v904_v29 = vmax.f32 %v833_v19, 0.0  ;;  %v886_v31 = vadd.f32 %v885_v23, %v770_v8  ;;  %v835_v32 = vadd.f32 %v834_v24, %v770_v8  ;;  %v903_v28 = vmax.f32 %v884_v43, 0.0 }
 0x18b   : > { %v887_v36 = vpop.f32.mrf.mxu1  ;;  %v838_v37 = vpop.f32.mrf.mxu0 }
 0x18c   : > { %v905_v38 = vmax.f32 %v835_v32, 0.0  ;;  %v888_v40 = vadd.f32 %v887_v36, %v770_v8  ;;  %v906_v44 = vmax.f32 %v886_v31, 0.0  ;;  %v3044_v48 = vpack.i.bf16 %v904_v29, %v900_v33 }
 0x18d   : > { %v891_v46 = vpop.f32.mrf.mxu1  ;;  %v840_v47 = vpop.f32.mrf.mxu0  ;;  %v839_v54 = vadd.f32 %v838_v37, %v775_v2  ;;  %v3066_v43 = vpack.c.bf16 %v904_v29, %v900_v33  ;;  %v2609_v33 = vld [vmem:[%s3635_s3 + $0x4] ss:$8 sps:$4 sm:$0xff]  }
 0x18e   : > { %v907_v53 = vmax.f32 %v888_v40, 0.0  ;;  %2366 = vrot.lane.b32.xlu1 %v3044_v48, %s2628_s18  ;;  %v2390_v56 = vpack.i.bf16 %v905_v38, %v901_v41  ;;  %v2370_v60 = vpack.i.bf16 %v906_v44, %v902_v51  ;;  %v841_v6 = vadd.f32 %v840_v47, %v775_v2  ;;  %2091 = vmatprep.mubr.msk.bf16.mxu0 %vm3666_vm7, %v2609_v33 }
 0x18f   : > { %v893_v27 = vpop.f32.mrf.mxu1  ;;  %v842_v55 = vpop.f32.mrf.mxu0  ;;  %v908_v5 = vmax.f32 %v839_v54, 0.0  ;;  %v892_v11 = vadd.f32 %v891_v46, %v775_v2  ;;  %v3068_v46 = vpack.c.bf16 %v906_v44, %v902_v51  ;;  %2141 = vmatprep.mubr.msk.bf16.mxu1 %vm3666_vm7, %v2609_v33  ;;  %v1218_v44 = vld [vmem:[%s3636_s4 + $0x10] sm:$0xff]  ;;  %v1216_v51 = vld [vmem:[%s3636_s4] sm:$0xff]  ;;  %vm3761_vm7 = vnez %v3709_v35 }
 0x190   : > { %v843_v58 = vadd.f32 %v842_v55, %v780_v0  ;;  %2391 = vrot.lane.b32.xlu0 %v2390_v56, %s2628_s18  ;;  %v894_v7 = vadd.f32 %v893_v27, %v775_v2  ;;  %v2395_v10 = vpack.i.bf16 %v907_v53, %v903_v28  ;;  %v909_v31 = vmax.f32 %v841_v6, 0.0 }
 0x191   : > { %v895_v30 = vpop.f32.mrf.mxu1  ;;  %v844_v59 = vpop.f32.mrf.mxu0  ;;  %v910_v34 = vmax.f32 %v892_v11, 0.0  ;;  %v3064_v40 = vpack.c.bf16 %v907_v53, %v903_v28  ;;  %v1217_v53 = vld [vmem:[%s3636_s4 + $0x8] sm:$0xff] }
 0x192   : > { %v912_v62 = vmax.f32 %v843_v58, 0.0  ;;  %v896_v63 = vadd.f32 %v895_v30, %v780_v0  ;;  %v845_v4 = vadd.f32 %v844_v59, %v780_v0  ;;  %2371 = vrot.lane.b32.xlu1 %v2370_v60, %s2628_s18  ;;  %v911_v32 = vmax.f32 %v894_v7, 0.0 }
 0x193   : > { %v897_v8 = vpop.f32.mrf.mxu1 }
 0x194   : > { %v898_v18 = vadd.f32 %v897_v8, %v780_v0  ;;  %v913_v19 = vmax.f32 %v845_v4, 0.0  ;;  %2396 = vrot.lane.b32.xlu0 %v2395_v10, %s2628_s18  ;;  %v3051_v21 = vpack.c.bf16 %v912_v62, %v908_v5  ;;  %v914_v23 = vmax.f32 %v896_v63, 0.0 }
 0x195   : > { %v3060_v0 = vpack.c.bf16 %v905_v38, %v901_v41  ;;  %v2415_v47 = vpack.i.bf16 %v912_v62, %v908_v5 }
 0x196   : > { %v915_v24 = vmax.f32 %v898_v18, 0.0  ;;  %2376 = vrot.lane.b32.xlu1 %v3044_v48, %s2629_s19  ;;  %v3056_v36 = vpack.c.bf16 %v913_v19, %v909_v31  ;;  %v3062_v2 = vpack.c.bf16 %v914_v23, %v910_v34  ;;  %v2450_v38 = vpack.i.bf16 %v913_v19, %v909_v31 }
 0x197   : > { %v2420_v41 = vpack.i.bf16 %v914_v23, %v910_v34 }
 0x198   : > { %2401 = vrot.lane.b32.xlu0 %v2390_v56, %s2629_s19  ;;  %v3058_v37 = vpack.c.bf16 %v915_v24, %v911_v32  ;;  %v2455_v29 = vpack.i.bf16 %v915_v24, %v911_v32 }
 0x19a   : > { %2381 = vrot.lane.b32.xlu1 %v2370_v60, %s2629_s19 }
 0x19c   : > { %2406 = vrot.lane.b32.xlu0 %v2395_v10, %s2629_s19 }
 0x19e   : > { %2386 = vrot.lane.b32.xlu1 %v3044_v48, %s2630_s20 }
 0x1a0   : > { %2411 = vrot.lane.b32.xlu0 %v2390_v56, %s2630_s20 }
 0x1a2   : > { %2416 = vrot.lane.b32.xlu1 %v2415_v47, %s2628_s18 }
 0x1a4   : > { %2451 = vrot.lane.b32.xlu0 %v2450_v38, %s2628_s18 }
 0x1a6   : > { %2421 = vrot.lane.b32.xlu1 %v2420_v41, %s2628_s18 }
 0x1a8   : > { %2456 = vrot.lane.b32.xlu0 %v2455_v29, %s2628_s18 }
 0x1aa   : > { %2426 = vrot.lane.b32.xlu1 %v2370_v60, %s2630_s20 }
 0x1ac   : > { %2461 = vrot.lane.b32.xlu0 %v2395_v10, %s2630_s20 }
 0x1ae   : > { %2431 = vrot.lane.b32.xlu1 %v2415_v47, %s2629_s19 }
 0x1b0   : > { %2481 = vrot.lane.b32.xlu0 %v2390_v56, %s2627_s17 }
 0x1b2   : > { %2436 = vrot.lane.b32.xlu1 %v2420_v41, %s2629_s19 }
 0x1b4   : > { %2491 = vrot.lane.b32.xlu0 %v2450_v38, %s2629_s19 }
 0x1b6   : > { %2441 = vrot.lane.b32.xlu1 %v2415_v47, %s2630_s20 }
 0x1b8   : > { %2496 = vrot.lane.b32.xlu0 %v2455_v29, %s2629_s19 }
 0x1ba   : > { %2446 = vrot.lane.b32.xlu1 %v2420_v41, %s2630_s20 }
 0x1bc   : > { %2501 = vrot.lane.b32.xlu0 %v2450_v38, %s2630_s20 }
 0x1be   : > { %2466 = vrot.lane.b32.xlu1 %v2415_v47, %s2627_s17 }
 0x1c0   : > { %2506 = vrot.lane.b32.xlu0 %v2455_v29, %s2630_s20 }
 0x1c2   : > { %2471 = vrot.lane.b32.xlu1 %v2420_v41, %s2627_s17 }
 0x1c4   : > { %2511 = vrot.lane.b32.xlu0 %v2450_v38, %s2627_s17 }
 0x1c6   : > { %2476 = vrot.lane.b32.xlu1 %v3044_v48, %s2627_s17  ;;  %v1219_v48 = vld [vmem:[%s3636_s4 + $0x18] sm:$0xff] }
 0x1c8   : > { %2516 = vrot.lane.b32.xlu0 %v2455_v29, %s2627_s17 }
 0x1ca   : > { %2486 = vrot.lane.b32.xlu1 %v2370_v60, %s2627_s17 }
 0x1cc   : > { %2521 = vrot.lane.b32.xlu0 %v2395_v10, %s2627_s17 }
 0x1ce   : > { %1232 = vperm.xlu1 %2364, %v1218_v44  }
 0x1d0   : > { %1237 = vperm.xlu0 %2363, %v1219_v48  }
 0x1d2   : > { %1222 = vperm.xlu1 %2364, %v1216_v51  }
 0x1d4   : > { %1227 = vperm.xlu0 %2363, %v1217_v53  }
 0x200   : > { %v2367_v54 = vpop.permute.xlu1 %2366 }
 0x201   : > { %v2369_v23 = vunpack.i.h.bf16 %v2367_v54  ;;  %v2368_v24 = vunpack.i.l.bf16 %v2367_v54 }
 0x202   : > { %v2392_v27 = vpop.permute.xlu0 %2391 }
 0x203   : > { %v2394_v4 = vunpack.i.h.bf16 %v2392_v27  ;;  %v2393_v5 = vunpack.i.l.bf16 %v2392_v27 }
 0x204   : > { %v2372_v55 = vpop.permute.xlu1 %2371 }
 0x205   : > { %v2374_v6 = vunpack.i.h.bf16 %v2372_v55  ;;  %v2373_v7 = vunpack.i.l.bf16 %v2372_v55  ;;  %v1084_v33 = vsel %vm3713_vm12, %v2368_v24, %v2393_v5  ;;  %v1085_v44 = vsel %vm3714_vm4, %v2369_v23, %v2394_v4  ;;  %vm3720_vm12 = vmmov %vm3717_vm3 }
 0x206   : > { %v2397_v56 = vpop.permute.xlu0 %2396  ;;  %vm3721_vm4 = vmmov %vm3717_vm3 }
 0x207   : > { %v2399_v31 = vunpack.i.h.bf16 %v2397_v56  ;;  %v2398_v32 = vunpack.i.l.bf16 %v2397_v56  ;;  %v1081_v48 = vsel %vm3715_vm11, %v2394_v4, %v2374_v6  ;;  %v1080_v51 = vsel %vm3716_vm5, %v2393_v5, %v2373_v7  ;;  %vm3722_vm11 = vmmov %vm3717_vm3 }
 0x208   : > { %v3115_v58 = vpop.permute.xlu1 %2376  ;;  %vm3723_vm5 = vmmov %vm3717_vm3 }
 0x20a   : > { %v3117_v28 = vpop.permute.xlu0 %2401 }
 0x20c   : > { %v3119_v30 = vpop.permute.xlu1 %2381 }
 0x20e   : > { %v3121_v59 = vpop.permute.xlu0 %2406 }
 0x210   : > { %v3123_v60 = vpop.permute.xlu1 %2386 }
 0x212   : > { %v3125_v62 = vpop.permute.xlu0 %2411 }
 0x214   : > { %v2417_v63 = vpop.permute.xlu1 %2416 }
 0x215   : > { %v2419_v10 = vunpack.i.h.bf16 %v2417_v63  ;;  %v2418_v11 = vunpack.i.l.bf16 %v2417_v63 }
 0x216   : > { %v2452_v8 = vpop.permute.xlu0 %2451 }
 0x217   : > { %v2454_v18 = vunpack.i.h.bf16 %v2452_v8  ;;  %v2453_v19 = vunpack.i.l.bf16 %v2452_v8  ;;  %v1089_v8 = vsel %vm3720_vm12, %v2399_v31, %v2369_v23  ;;  %vm3726_vm12 = vcmp.lt.s32.totalorder %v2737_v22, 1 }
 0x218   : > { %v2422_v34 = vpop.permute.xlu1 %2421 }
 0x219   : > { %v1086_v47 = vsel %vm3711_vm8, %v2418_v11, %v2453_v19  ;;  %v1087_v38 = vsel %vm3712_vm10, %v2419_v10, %v2454_v18  ;;  %v2424_v41 = vunpack.i.h.bf16 %v2422_v34  ;;  %v2423_v29 = vunpack.i.l.bf16 %v2422_v34  ;;  %vm3718_vm8 = vmmov %vm3717_vm3 }
 0x21a   : > { %v2457_v53 = vpop.permute.xlu0 %2456  ;;  %vm3719_vm10 = vmmov %vm3717_vm3  ;;  %v2047_v34 = vpack.c.bf16 %v1087_v38, %v1086_v47  ;;  %v2053_v47 = vpack.c.bf16 %v1085_v44, %v1084_v33  ;;  %v2404_v38 = vunpack.i.h.bf16 %v3117_v28  ;;  %v2378_v33 = vunpack.i.l.bf16 %v3115_v58 }
 0x21b   : > { %v1083_v54 = vsel %vm3717_vm3, %v2454_v18, %v2424_v41  ;;  %v1082_v27 = vsel %vm3718_vm8, %v2453_v19, %v2423_v29  ;;  %v2459_v55 = vunpack.i.h.bf16 %v2457_v53  ;;  %v2458_v56 = vunpack.i.l.bf16 %v2457_v53  ;;  %vm3724_vm8 = vmmov %vm3717_vm3 }
 0x21c   : > { %v1088_v63 = vsel %vm3719_vm10, %v2398_v32, %v2368_v24  ;;  %v2044_v4 = vpack.c.bf16 %v1083_v54, %v1082_v27  ;;  %v3147_v16 = vpop.permute.xlu1 %2426  ;;  %v2050_v24 = vpack.c.bf16 %v1081_v48, %v1080_v51  ;;  %vm3725_vm10 = vmmov %vm3717_vm3  ;;  %v2384_v44 = vunpack.i.h.bf16 %v3119_v30 }
 0x21d   : > { %v1078_v5 = vsel %vm3721_vm4, %v2423_v29, %v2458_v56  ;;  %v1079_v18 = vsel %vm3722_vm11, %v2424_v41, %v2459_v55  ;;  %v1090_v19 = vsel %vm3723_vm5, %v2458_v56, %v2418_v11  ;;  %v1091_v53 = vsel %vm3717_vm3, %v2459_v55, %v2419_v10  ;;  %vm3727_vm4 = vmmov %vm3726_vm12 }
 0x21e   : > { %v2094_v15 = vpack.c.bf16 %v1091_v53, %v1090_v19  ;;  %v2097_v14 = vpack.c.bf16 %v1079_v18, %v1078_v5  ;;  %v3157_v23 = vpop.permute.xlu0 %2461  ;;  %2045 = vmatprep.subr.msk.bf16.mxu0 %vm2882_vm15, %v2044_v4  ;;  %v2403_v29 = vunpack.i.l.bf16 %v3117_v28  ;;  %v1076_v11 = vsel %vm3724_vm8, %v2373_v7, %v2398_v32  ;;  %vm3728_vm11 = vmmov %vm3727_vm4 }
 0x21f   : > { %2048 = vmatpush1.bf16.msk.msra.mxu0 %vm2891_vm1, %v2047_v34  ;;  %v1077_v10 = vsel %vm3725_vm10, %v2374_v6, %v2399_v31  ;;  %v2100_v41 = vpack.c.bf16 %v1089_v8, %v1088_v63  ;;  %v2379_v28 = vunpack.i.h.bf16 %v3115_v58  ;;  %v2383_v7 = vunpack.i.l.bf16 %v3119_v30  ;;  %vm3729_vm5 = vmmov %vm3727_vm4 }
 0x220   : > { %v3169_v48 = vpop.permute.xlu1 %2431  ;;  %2051 = vmatprep.subr.msk.bf16.mxu0 %vm2882_vm15, %v2050_v24  ;;  %2095 = vmatprep.subr.msk.bf16.mxu1 %vm2863_vm13, %v2094_v15  ;;  %v2103_v31 = vpack.c.bf16 %v1077_v10, %v1076_v11  ;;  %v3187_v15 = vsel %vm3726_vm12, %v2378_v33, %v2403_v29  ;;  %v2409_v30 = vunpack.i.h.bf16 %v3121_v59  ;;  %v3200_v51 = vsel %vm3728_vm11, %v2404_v38, %v2384_v44  ;;  %vm3730_vm3 = vmmov %vm3727_vm4 }
 0x221   : > { %2098 = vmatpush1.bf16.msk.msra.mxu1 %vm2873_vm14, %v2097_v14  ;;  %v3191_v58 = vsel %vm3727_vm4, %v2379_v28, %v2404_v38  ;;  %v2408_v14 = vunpack.i.l.bf16 %v3121_v59  ;;  %v3204_v54 = vsel %vm3729_vm5, %v2403_v29, %v2383_v7  ;;  %v2413_v55 = vunpack.i.l.bf16 %v3125_v62  ;;  %vm3731_vm8 = vmmov %vm3730_vm3 }
 0x222   : > { %v3181_v6 = vpop.permute.xlu0 %2481  ;;  %2101 = vmatprep.subr.msk.bf16.mxu1 %vm2863_vm13, %v2100_v41  ;;  %v2062_v27 = vpack.c.bf16 %v3191_v58, %v3187_v15  ;;  %v2433_v56 = vunpack.i.l.bf16 %v3169_v48  ;;  %v2115_v34 = vpack.c.bf16 %v3200_v51, %v3204_v54  ;;  %v1013_v5 = vsel %vm3731_vm8, %v2384_v44, %v2409_v30  ;;  %vm3732_vm10 = vmmov %vm3730_vm3 }
 0x223   : > { %2054 = vmatpush1.bf16.msk.msra.mxu0 %vm2891_vm1, %v2053_v47  ;;  %v3219_v4 = vsel %vm3730_vm3, %v2383_v7, %v2408_v14  ;;  %v3229_v19 = vsel %vm3732_vm10, %v2408_v14, %v2378_v33  ;;  %vm3733_vm12 = vmmov %vm3730_vm3  ;;  %v2389_v47 = vunpack.i.h.bf16 %v3123_v60  ;;  %vm3736_vm5 = vcmp.lt.s32.totalorder %v2737_v22, 2 }
 0x224   : > { %v2437_v32 = vpop.permute.xlu1 %2436  ;;  %1269 = vmatprep.subr.bf16.mxu0 %v3056_v36  ;;  %v2434_v36 = vunpack.i.h.bf16 %v3169_v48  ;;  %vm3734_vm4 = vmmov %vm3730_vm3  ;;  %v2464_v58 = vunpack.i.h.bf16 %v3157_v23 }
 0x225   : > { %2104 = vmatpush1.bf16.msk.msra.mxu1 %vm2873_vm14, %v2103_v31  ;;  %v2439_v38 = vunpack.i.h.bf16 %v2437_v32  ;;  %v2438_v29 = vunpack.i.l.bf16 %v2437_v32  ;;  %vm3735_vm11 = vmmov %vm3730_vm3 }
 0x226   : > { %v2492_v59 = vpop.permute.xlu0 %2491  ;;  %1322 = vmatprep.subr.bf16.mxu1 %v3058_v37  ;;  %v2414_v37 = vunpack.i.h.bf16 %v3125_v62  ;;  %v1025_v10 = vsel %vm3735_vm11, %v2409_v30, %v2379_v28  ;;  %vm3737_vm3 = vmmov %vm3736_vm5  ;;  %v2463_v30 = vunpack.i.l.bf16 %v3157_v23  ;;  %v2428_v23 = vunpack.i.l.bf16 %v3147_v16 }
 0x227   : > { %v2494_v63 = vunpack.i.h.bf16 %v2492_v59  ;;  %v2493_v8 = vunpack.i.l.bf16 %v2492_v59  ;;  %1270 = vmatpush1.bf16.msra.mxu0 %v3051_v21  ;;  %v2388_v21 = vunpack.i.l.bf16 %v3123_v60  ;;  %v2429_v60 = vunpack.i.h.bf16 %v3147_v16  ;;  %vm3738_vm8 = vmmov %vm3734_vm4 }
 0x228   : > { %v3224_v18 = vpop.permute.xlu1 %2441  ;;  %1271 = vmatprep.subr.bf16.mxu0 %v3060_v0  ;;  %vm3739_vm10 = vmmov %vm3734_vm4 }
 0x229   : > { %v1022_v53 = vsel %vm3733_vm12, %v2433_v56, %v2493_v8  ;;  %v1023_v24 = vsel %vm3734_vm4, %v2434_v36, %v2494_v63  ;;  %1323 = vmatpush1.bf16.msra.mxu1 %v3062_v2  ;;  %v3245_v41 = vsel %vm3736_vm5, %v2388_v21, %v2413_v55  ;;  %v3250_v2 = vsel %vm3737_vm3, %v2389_v47, %v2414_v37  ;;  %vm3740_vm12 = vmmov %vm3734_vm4 }
 0x22a   : > { %v2056_v11 = vpack.c.bf16 %v1023_v24, %v1022_v53  ;;  %v2497_v0 = vpop.permute.xlu0 %2496  ;;  %1324 = vmatprep.subr.bf16.mxu1 %v3064_v40  ;;  %v1018_v40 = vsel %vm3738_vm8, %v2493_v8, %v2438_v29  ;;  %v1019_v28 = vsel %vm3739_vm10, %v2494_v63, %v2439_v38  ;;  %vm3741_vm11 = vmmov %vm3734_vm4  ;;  %v2444_v63 = vunpack.i.h.bf16 %v3224_v18 }
 0x22b   : > { %v2499_v48 = vunpack.i.h.bf16 %v2497_v0  ;;  %v2498_v33 = vunpack.i.l.bf16 %v2497_v0  ;;  %1272 = vmatpush1.bf16.msra.mxu0 %v3066_v43  ;;  %vm3742_vm5 = vmmov %vm3734_vm4  ;;  %v2443_v8 = vunpack.i.l.bf16 %v3224_v18 }
 0x22c   : > { %v2447_v44 = vpop.permute.xlu1 %2446  ;;  %2057 = vmatprep.subr.msk.bf16.mxu0 %vm2920_vm0, %v2056_v11  ;;  %vm3743_vm8 = vmmov %vm3737_vm3 }
 0x22d   : > { %v1014_v7 = vsel %vm3740_vm12, %v2438_v29, %v2498_v33  ;;  %v1015_v43 = vsel %vm3734_vm4, %v2439_v38, %v2499_v48  ;;  %v1026_v31 = vsel %vm3741_vm11, %v2498_v33, %v2433_v56  ;;  %v1027_v15 = vsel %vm3742_vm5, %v2499_v48, %v2434_v36  ;;  %1325 = vmatpush1.bf16.msra.mxu1 %v3068_v46  ;;  %vm3744_vm10 = vmmov %vm3737_vm3 }
 0x22e   : > { %v2059_v14 = vpack.c.bf16 %v1027_v15, %v1026_v31  ;;  %v2106_v32 = vpack.c.bf16 %v1015_v43, %v1014_v7  ;;  %v2502_v59 = vpop.permute.xlu0 %2501  ;;  %v2065_v56 = vpack.c.bf16 %v1025_v10, %v3229_v19  ;;  %v2112_v38 = vpack.c.bf16 %v1013_v5, %v3219_v4  ;;  %vm3746_vm4 = vmmov %vm3737_vm3 }
 0x22f   : > { %v2504_v53 = vunpack.i.h.bf16 %v2502_v59  ;;  %v2503_v24 = vunpack.i.l.bf16 %v2502_v59  ;;  %v2109_v36 = vpack.c.bf16 %v1019_v28, %v1018_v40  ;;  %v2074_v46 = vpack.c.bf16 %v3250_v2, %v3245_v41  ;;  %vm3747_vm11 = vmmov %vm3737_vm3 }
 0x230   : > { %v3274_v29 = vpop.permute.xlu1 %2466  ;;  %2060 = vmatpush1.bf16.msk.msra.mxu0 %vm2953_vm9, %v2059_v14  ;;  %2107 = vmatprep.subr.msk.bf16.mxu1 %vm2934_vm2, %v2106_v32  ;;  %v3291_v5 = vsel %vm3744_vm10, %v2414_v37, %v2429_v60  ;;  %v2449_v19 = vunpack.i.h.bf16 %v2447_v44  ;;  %v2448_v11 = vunpack.i.l.bf16 %v2447_v44  ;;  %vm3745_vm12 = vnez %v3692_v57  ;;  %vm3748_vm5 = vmmov %vm3737_vm3 }
 0x231   : > { %v958_v18 = vsel %vm3737_vm3, %v2443_v8, %v2503_v24  ;;  %v959_v4 = vsel %vm3743_vm8, %v2444_v63, %v2504_v53  ;;  %2063 = vmatprep.subr.msk.bf16.mxu0 %vm2920_vm0, %v2062_v27  ;;  %2110 = vmatpush1.bf16.msk.msra.mxu1 %vm3745_vm12, %v2109_v36  ;;  %v948_v10 = vsel %vm3746_vm4, %v2428_v23, %v2463_v30  ;;  %vm3749_vm8 = vmmov %vm3737_vm3  ;;  %v2469_v7 = vunpack.i.h.bf16 %v3274_v29 }
 0x232   : > { %v2068_v0 = vpack.c.bf16 %v959_v4, %v958_v18  ;;  %v2507_v16 = vpop.permute.xlu0 %2506  ;;  %v949_v41 = vsel %vm3747_vm11, %v2429_v60, %v2464_v58  ;;  %2113 = vmatprep.subr.msk.bf16.mxu1 %vm2934_vm2, %v2112_v38  ;;  %v960_v27 = vsel %vm3748_vm5, %v2463_v30, %v2388_v21  ;;  %v961_v37 = vsel %vm3737_vm3, %v2464_v58, %v2389_v47  ;;  %vm3750_vm10 = vmmov %vm3737_vm3 }
 0x233   : > { %v2509_v48 = vunpack.i.h.bf16 %v2507_v16  ;;  %v2508_v33 = vunpack.i.l.bf16 %v2507_v16  ;;  %v954_v2 = vsel %vm3749_vm8, %v2503_v24, %v2448_v11  ;;  %v955_v40 = vsel %vm3750_vm10, %v2504_v53, %v2449_v19  ;;  %vm3751_vm4 = vmmov %vm3737_vm3 }
 0x234   : > { %v2472_v28 = vpop.permute.xlu1 %2471  ;;  %2066 = vmatpush1.bf16.msk.msra.mxu0 %vm2953_vm9, %v2065_v56  ;;  %vm3752_vm11 = vmmov %vm3737_vm3  ;;  %vm3754_vm8 = vnez %v3697_v1  ;;  %v2468_v43 = vunpack.i.l.bf16 %v3274_v29  ;;  %v2121_v53 = vpack.c.bf16 %v955_v40, %v954_v2  ;;  %v2484_v29 = vunpack.i.h.bf16 %v3181_v6 }
 0x235   : > { %v950_v60 = vsel %vm3751_vm4, %v2448_v11, %v2508_v33  ;;  %v951_v44 = vsel %vm3752_vm11, %v2449_v19, %v2509_v48  ;;  %vm3753_vm5 = vmmov %vm3737_vm3  ;;  %v963_v47 = vsel %vm3737_vm3, %v2509_v48, %v2444_v63  ;;  %2069 = vmatprep.subr.msk.bf16.mxu0 %vm3754_vm8, %v2068_v0  ;;  %2116 = vmatpush1.bf16.msk.msra.mxu1 %vm3745_vm12, %v2115_v34  ;;  %v2474_v30 = vunpack.i.h.bf16 %v2472_v28 }
 0x236   : > { %v962_v21 = vsel %vm3753_vm5, %v2508_v33, %v2443_v8  ;;  %v2118_v15 = vpack.c.bf16 %v951_v44, %v950_v60  ;;  %v2512_v58 = vpop.permute.xlu0 %2511  ;;  %v2473_v14 = vunpack.i.l.bf16 %v2472_v28  ;;  %vm3755_vm10 = vmmov %vm3737_vm3  ;;  %v2124_v8 = vpack.c.bf16 %v949_v41, %v948_v10 }
 0x237   : > { %v2071_v31 = vpack.c.bf16 %v963_v47, %v962_v21  ;;  %v2514_v32 = vunpack.i.h.bf16 %v2512_v58  ;;  %v2513_v59 = vunpack.i.l.bf16 %v2512_v58  ;;  %v952_v63 = vsel %vm3755_vm10, %v2413_v55, %v2428_v23  ;;  %v2610_v58 = vld [vmem:[%s3635_s3 + $0x14] ss:$8 sps:$4 sm:$0xff]  }
 0x238   : > { %v2477_v24 = vpop.permute.xlu1 %2476  ;;  %vm3756_vm4 = vnez %v3705_v26  ;;  %vm3757_vm11 = vcmp.lt.s32.totalorder %v2737_v22, 126  ;;  %v2077_v34 = vpack.c.bf16 %v961_v37, %v960_v27  ;;  %v2127_v19 = vpack.c.bf16 %v3291_v5, %v952_v63 }
 0x239   : > { %2072 = vmatpush1.bf16.msk.msra.mxu0 %vm2984_vm6, %v2071_v31  ;;  %2119 = vmatprep.subr.msk.bf16.mxu1 %vm3756_vm4, %v2118_v15  ;;  %v1146_v51 = vsel %vm3757_vm11, %v2513_v59, %v2473_v14  ;;  %vm3758_vm5 = vmmov %vm3757_vm11  ;;  %v2479_v38 = vunpack.i.h.bf16 %v2477_v24  ;;  %v2478_v23 = vunpack.i.l.bf16 %v2477_v24  ;;  %v2483_v1 = vunpack.i.l.bf16 %v3181_v6  ;;  %v2607_v15 = vld [vmem:[%s3635_s3] ss:$8 sps:$4 sm:$0xff]  }
 0x23a   : > { %v1147_v54 = vsel %vm3758_vm5, %v2514_v32, %v2474_v30  ;;  %vm3759_vm3 = vmmov %vm3758_vm5  ;;  %2075 = vmatprep.subr.msk.bf16.mxu0 %vm3754_vm8, %v2074_v46  ;;  %2122 = vmatpush1.bf16.msk.msra.mxu1 %vm3761_vm7, %v2121_v53  ;;  %v2517_v36 = vpop.permute.xlu0 %2516 }
 0x23b   : > { %v1150_v62 = vsel %vm3759_vm3, %v2468_v43, %v2513_v59  ;;  %vm3760_vm10 = vmmov %vm3759_vm3  ;;  %v2080_v56 = vpack.c.bf16 %v1147_v54, %v1146_v51  ;;  %v2519_v18 = vunpack.i.h.bf16 %v2517_v36  ;;  %v2518_v4 = vunpack.i.l.bf16 %v2517_v36  ;;  %2125 = vmatprep.subr.msk.bf16.mxu1 %vm3756_vm4, %v2124_v8 }
 0x23c   : > { %v1151_v55 = vsel %vm3760_vm10, %v2469_v7, %v2514_v32  ;;  %v2487_v11 = vpop.permute.xlu1 %2486  ;;  %vm3762_vm8 = vmmov %vm3759_vm3 }
 0x23d   : > { %v2083_v46 = vpack.c.bf16 %v1151_v55, %v1150_v62  ;;  %2078 = vmatpush1.bf16.msk.msra.mxu0 %vm2984_vm6, %v2077_v34  ;;  %v1149_v0 = vsel %vm3762_vm8, %v2479_v38, %v2484_v29  ;;  %vm3763_vm11 = vmmov %vm3759_vm3  ;;  %v2489_v5 = vunpack.i.h.bf16 %v2487_v11  ;;  %v2488_v41 = vunpack.i.l.bf16 %v2487_v11 }
 0x23e   : > { %v1142_v16 = vsel %vm3763_vm11, %v2473_v14, %v2518_v4  ;;  %vm3764_vm5 = vmmov %vm3759_vm3  ;;  %2128 = vmatpush1.bf16.msk.msra.mxu1 %vm3761_vm7, %v2127_v19  ;;  %v2522_v48 = vpop.permute.xlu0 %2521 }
 0x23f   : > { %v1143_v10 = vsel %vm3764_vm5, %v2474_v30, %v2519_v18  ;;  %vm3765_vm4 = vmmov %vm3759_vm3  ;;  %vm3766_vm3 = vnez %v3676_v49  ;;  %v2524_v37 = vunpack.i.h.bf16 %v2522_v48  ;;  %v2523_v2 = vunpack.i.l.bf16 %v2522_v48  ;;  %v2612_v49 = vld [vmem:[%s3635_s3 + $0x10] ss:$8 sps:$4 sm:$0xff]  }
 0x240   : > { %v1154_v26 = vsel %vm3765_vm4, %v2518_v4, %v2468_v43  ;;  %2081 = vmatprep.subr.msk.bf16.mxu0 %vm3766_vm3, %v2080_v56  ;;  %vm3767_vm10 = vmmov %vm3765_vm4  ;;  %v2133_v17 = vpack.c.bf16 %v1143_v10, %v1142_v16  ;;  %vm3771_vm5 = vnez %v3678_v52  ;;  %v3779_v52 = vmov 0  }
 0x241   : > { %v1155_v6 = vsel %vm3767_vm10, %v2519_v18, %v2469_v7  ;;  %vm3768_vm6 = vmmov %vm3765_vm4  ;;  %2084 = vmatpush2.bf16.msk.msra.mxu0 %vm3771_vm5, %v2083_v46  ;;  %v1140_v35 = vsel %vm3765_vm4, %v2488_v41, %v2523_v2 }
 0x242   : > { %v1148_v33 = vsel %vm3768_vm6, %v2478_v23, %v2483_v1  ;;  %v2130_v27 = vpack.c.bf16 %v1155_v6, %v1154_v26  ;;  %vm3769_vm8 = vmmov %vm3765_vm4  ;;  %vm3774_vm6 = vnez %v3672_v39 }
 0x243   : > { %v1145_v40 = vsel %vm3769_vm8, %v2484_v29, %v2489_v5  ;;  %vm3770_vm11 = vmmov %vm3765_vm4  ;;  %v2089_v47 = vpack.c.bf16 %v1149_v0, %v1148_v33 }
 0x244   : > { %v1144_v28 = vsel %vm3770_vm11, %v2483_v1, %v2488_v41  ;;  %vm3772_vm7 = vmmov %vm3765_vm4  ;;  %2131 = vmatprep.subr.msk.bf16.mxu1 %vm3774_vm6, %v2130_v27  ;;  %vm3776_vm11 = vnez %v3674_v45 }
 0x245   : > { %v2086_v60 = vpack.c.bf16 %v1145_v40, %v1144_v28  ;;  %v1141_v44 = vsel %vm3772_vm7, %v2489_v5, %v2524_v37  ;;  %vm3773_vm10 = vmmov %vm3765_vm4  ;;  %2134 = vmatpush2.bf16.msk.msra.mxu1 %vm3776_vm11, %v2133_v17 }
 0x246   : > { %v1152_v21 = vsel %vm3773_vm10, %v2523_v2, %v2478_v23  ;;  %vm3775_vm8 = vmmov %vm3765_vm4  ;;  %v2139_v43 = vpack.c.bf16 %v1141_v44, %v1140_v35  ;;  %vm3777_vm4 = vcmask 261120  }
 0x247   : > { %v1153_v7 = vsel %vm3775_vm8, %v2524_v37, %v2479_v38  ;;  %2087 = vmatprep.subr.msk.bf16.mxu0 %vm3766_vm3, %v2086_v60  ;;  %vm3778_vm3 = vmmov %vm3777_vm4 }
 0x248   : > { %v2136_v31 = vpack.c.bf16 %v1153_v7, %v1152_v21  ;;  %2090 = vmatpush2.bf16.msk.msra.mxu0 %vm3771_vm5, %v2089_v47  ;;  %vm3780_vm5 = vcmp.lt.s32.totalorder %v2737_v22, 127 }
 0x249   : > { %v1233_v39 = vpop.permute.xlu1 %1232  ;;  %vm3781_vm7 = vmmov %vm3780_vm5 }
 0x24a   : > { %2137 = vmatprep.subr.msk.bf16.mxu1 %vm3774_vm6, %v2136_v31  ;;  %vm3782_vm10 = vmmov %vm3780_vm5 }
 0x24b   : > { %2140 = vmatpush2.bf16.msk.msra.mxu1 %vm3776_vm11, %v2139_v43  ;;  %1298 = vmatmul.mubr.bf16.vlgmr.msra.gmra.mxu0 %v2607_v15  ;;  %v1238_v30 = vpop.permute.xlu0 %1237  ;;  %vm3783_vm6 = vmmov %vm3780_vm5 }
 0x24c   : > { %2092 = vmatprep.mubr.msk.bf16.mxu0 %vm3777_vm4, %v2610_v58  ;;  %vm3784_vm8 = vmmov %vm3780_vm5 }
 0x24d   : > { %v1223_v14 = vpop.permute.xlu1 %1222  ;;  %vm3785_vm11 = vmmov %vm3780_vm5 }
 0x24e   : > { %1351 = vmatmul.mubr.bf16.vlgmr.msra.gmra.mxu1 %v2607_v15  ;;  %vm3786_vm4 = vmmov %vm3780_vm5 }
 0x24f   : > { %2142 = vmatprep.mubr.msk.bf16.mxu1 %vm3778_vm3, %v2610_v58  ;;  %v1228_v63 = vpop.permute.xlu0 %1227  ;;  %vm3787_vm3 = vmmov %vm3786_vm4 }
 0x253   : > { %1308 = vmatmul.mubr.bf16.gmra.mxu0 %v2612_v49 }
 0x254   : > { %1616 = vmatprep.mubr.bf16.mxu0 %v3779_v52 }
 0x256   : > { %1361 = vmatmul.mubr.bf16.gmra.mxu1 %v2612_v49 }
 0x257   : > { %1669 = vmatprep.mubr.bf16.mxu1 %v3779_v52 }
 0x30b   : > { %v1299_v45 = vpop.f32.mrf.mxu0 }
 0x30c   : > { %v1300_v8 = vadd.f32 %v1299_v45, %v1223_v14 }
 0x30d   : > { %v1301_v59 = vpop.f32.mrf.mxu0 }
 0x30e   : > { %v1352_v32 = vpop.f32.mrf.mxu1  ;;  %v1302_v62 = vadd.f32 %v1301_v59, %v1223_v14  ;;  %v1371_v56 = vmax.f32 %v1300_v8, 0.0 }
 0x30f   : > { %v3410_v53 = vadd.f32 %v1352_v32, %v1223_v14  ;;  %v1303_v51 = vpop.f32.mrf.mxu0 }
 0x310   : > { %v1354_v24 = vpop.f32.mrf.mxu1  ;;  %v1304_v54 = vadd.f32 %v1303_v51, %v1228_v63  ;;  %v1372_v0 = vmax.f32 %v1302_v62, 0.0 }
 0x311   : > { %v1305_v34 = vpop.f32.mrf.mxu0  ;;  %v1373_v23 = vmax.f32 %v3410_v53, 0.0  ;;  %v1355_v16 = vadd.f32 %v1354_v24, %v1223_v14 }
 0x312   : > { %v1356_v55 = vpop.f32.mrf.mxu1  ;;  %v1375_v38 = vmax.f32 %v1304_v54, 0.0  ;;  %v1306_v29 = vadd.f32 %v1305_v34, %v1228_v63 }
 0x313   : > { %v1357_v36 = vadd.f32 %v1356_v55, %v1228_v63  ;;  %v1309_v4 = vpop.f32.mrf.mxu0  ;;  %v1374_v28 = vmax.f32 %v1355_v16, 0.0 }
 0x314   : > { %v1358_v18 = vpop.f32.mrf.mxu1  ;;  %v3413_v19 = vpack.c.bf16 %v1375_v38, %v1371_v56  ;;  %v1376_v46 = vmax.f32 %v1306_v29, 0.0  ;;  %v1310_v10 = vadd.f32 %v1309_v4, %v1233_v39  ;;  %v2525_v17 = vpack.i.bf16 %v1375_v38, %v1371_v56  ;;  %v1543_v38 = vld [vmem:[%s3638_s6] sm:$0xff]  ;;  %v1545_v29 = vld [vmem:[%s3638_s6 + $0x10] sm:$0xff]  ;;  %v1711_v4 = vld [vmem:[%s3640_s8 + $0x8] sm:$0xff] }
 0x315   : > { %v1377_v1 = vmax.f32 %v1357_v36, 0.0  ;;  %v1359_v11 = vadd.f32 %v1358_v18, %v1228_v63  ;;  %v1311_v6 = vpop.f32.mrf.mxu0  ;;  %v1544_v36 = vld [vmem:[%s3638_s6 + $0x8] sm:$0xff]  ;;  %v1710_v18 = vld [vmem:[%s3640_s8] sm:$0xff] }
 0x316   : > { %v1362_v26 = vpop.f32.mrf.mxu1  ;;  %v1312_v33 = vadd.f32 %v1311_v6, %v1233_v39  ;;  %2526 = vrot.lane.b32.xlu1 %v2525_v17, %s2628_s18  ;;  %v2530_v2 = vpack.i.bf16 %v1376_v46, %v1372_v0  ;;  %v1379_v60 = vmax.f32 %v1310_v10, 0.0  ;;  %v3419_v21 = vpack.c.bf16 %v1376_v46, %v1372_v0  ;;  %v1713_v46 = vld [vmem:[%s3640_s8 + $0x18] sm:$0xff] }
 0x317   : > { %v3415_v5 = vpack.c.bf16 %v1377_v1, %v1373_v23  ;;  %v1378_v41 = vmax.f32 %v1359_v11, 0.0  ;;  %v1363_v48 = vadd.f32 %v1362_v26, %v1233_v39  ;;  %v1313_v37 = vpop.f32.mrf.mxu0 }
 0x318   : > { %v1364_v27 = vpop.f32.mrf.mxu1  ;;  %v1314_v40 = vadd.f32 %v1313_v37, %v1238_v30  ;;  %2531 = vrot.lane.b32.xlu0 %v2530_v2, %s2628_s18  ;;  %v1380_v58 = vmax.f32 %v1312_v33, 0.0 }
 0x319   : > { %v1315_v44 = vpop.f32.mrf.mxu0  ;;  %v1365_v47 = vadd.f32 %v1364_v27, %v1233_v39  ;;  %v1381_v15 = vmax.f32 %v1363_v48, 0.0  ;;  %v3421_v45 = vpack.c.bf16 %v1378_v41, %v1374_v28  ;;  %v2560_v56 = vpack.i.bf16 %v1378_v41, %v1374_v28 }
 0x31a   : > { %v1366_v35 = vpop.f32.mrf.mxu1  ;;  %v1383_v7 = vmax.f32 %v1314_v40, 0.0  ;;  %v1316_v31 = vadd.f32 %v1315_v44, %v1238_v30 }
 0x31b   : > { %v1367_v43 = vadd.f32 %v1366_v35, %v1238_v30  ;;  %v1382_v53 = vmax.f32 %v1365_v47, 0.0 }
 0x31c   : > { %v1368_v49 = vpop.f32.mrf.mxu1  ;;  %v3423_v14 = vpack.c.bf16 %v1383_v7, %v1379_v60  ;;  %v1384_v59 = vmax.f32 %v1316_v31, 0.0  ;;  %v2535_v8 = vpack.i.bf16 %v1383_v7, %v1379_v60 }
 0x31d   : > { %v1385_v32 = vmax.f32 %v1367_v43, 0.0  ;;  %v1369_v63 = vadd.f32 %v1368_v49, %v1238_v30  ;;  %v2545_v30 = vpack.i.bf16 %v1377_v1, %v1373_v23  ;;  %v1546_v23 = vld [vmem:[%s3638_s6 + $0x18] sm:$0xff]  ;;  %v1712_v1 = vld [vmem:[%s3640_s8 + $0x10] sm:$0xff] }
 0x31e   : > { %v2550_v54 = vpack.i.bf16 %v1384_v59, %v1380_v58  ;;  %2536 = vrot.lane.b32.xlu1 %v2535_v8, %s2628_s18  ;;  %v3428_v39 = vpack.c.bf16 %v1384_v59, %v1380_v58 }
 0x31f   : > { %v3425_v24 = vpack.c.bf16 %v1385_v32, %v1381_v15  ;;  %v1386_v51 = vmax.f32 %v1369_v63, 0.0  ;;  %v2540_v55 = vpack.i.bf16 %v1385_v32, %v1381_v15 }
 0x320   : > { %2551 = vrot.lane.b32.xlu0 %v2550_v54, %s2628_s18 }
 0x321   : > { %v3431_v62 = vpack.c.bf16 %v1386_v51, %v1382_v53  ;;  %v2555_v34 = vpack.i.bf16 %v1386_v51, %v1382_v53 }
 0x322   : > { %2541 = vrot.lane.b32.xlu1 %v2540_v55, %s2628_s18 }
 0x324   : > { %2556 = vrot.lane.b32.xlu0 %v2555_v34, %s2628_s18 }
 0x326   : > { %2546 = vrot.lane.b32.xlu1 %v2545_v30, %s2628_s18 }
 0x328   : > { %2561 = vrot.lane.b32.xlu0 %v2560_v56, %s2628_s18 }
 0x32a   : > { %2566 = vrot.lane.b32.xlu1 %v2535_v8, %s2629_s19 }
 0x32c   : > { %2581 = vrot.lane.b32.xlu0 %v2530_v2, %s2629_s19 }
 0x32e   : > { %2571 = vrot.lane.b32.xlu1 %v2540_v55, %s2629_s19 }
 0x330   : > { %2591 = vrot.lane.b32.xlu0 %v2550_v54, %s2629_s19 }
 0x332   : > { %2576 = vrot.lane.b32.xlu1 %v2525_v17, %s2629_s19 }
 0x334   : > { %2596 = vrot.lane.b32.xlu0 %v2555_v34, %s2629_s19 }
 0x336   : > { %2586 = vrot.lane.b32.xlu1 %v2545_v30, %s2629_s19 }
 0x338   : > { %2601 = vrot.lane.b32.xlu0 %v2560_v56, %s2629_s19  ;;  %s3605_s19 = scalar_lea.vmem %s3641_s9, %s2206_s21 }
 0x33a   : > { %1549 = vperm.xlu1 %2364, %v1543_v38  }
 0x33c   : > { %1554 = vperm.xlu0 %2363, %v1544_v36  }
 0x33e   : > { %1559 = vperm.xlu1 %2364, %v1545_v29  }
 0x340   : > { %1564 = vperm.xlu0 %2363, %v1546_v23  }
 0x342   : > { %1716 = vperm.xlu1 %2364, %v1710_v18  }
 0x344   : > { %1721 = vperm.xlu0 %2363, %v1711_v4  }
 0x346   : > { %1726 = vperm.xlu1 %2364, %v1712_v1  }
 0x348   : > { %1731 = vperm.xlu0 %2363, %v1713_v46  }
 0x388   : > { %v2527_v11 = vpop.permute.xlu1 %2526 }
 0x389   : > { %v2528_v2 = vunpack.i.l.bf16 %v2527_v11  ;;  %v2529_v35 = vunpack.i.h.bf16 %v2527_v11 }
 0x38a   : > { %v2532_v0 = vpop.permute.xlu0 %2531 }
 0x38b   : > { %v2533_v48 = vunpack.i.l.bf16 %v2532_v0  ;;  %v2534_v44 = vunpack.i.h.bf16 %v2532_v0 }
 0x38d   : > { %v1491_v43 = vsel %vm3782_vm10, %v2528_v2, %v2533_v48  ;;  %vm3790_vm10 = vmmov %vm3787_vm3 }
 0x390   : > { %v2537_v16 = vpop.permute.xlu1 %2536 }
 0x391   : > { %v2539_v26 = vunpack.i.h.bf16 %v2537_v16  ;;  %v2538_v6 = vunpack.i.l.bf16 %v2537_v16 }
 0x392   : > { %v2552_v10 = vpop.permute.xlu0 %2551 }
 0x393   : > { %v2554_v17 = vunpack.i.h.bf16 %v2552_v10  ;;  %v2553_v41 = vunpack.i.l.bf16 %v2552_v10 }
 0x394   : > { %v2542_v37 = vpop.permute.xlu1 %2541 }
 0x395   : > { %v1493_v33 = vsel %vm3780_vm5, %v2538_v6, %v2553_v41  ;;  %v1494_v27 = vsel %vm3781_vm7, %v2539_v26, %v2554_v17  ;;  %v2544_v40 = vunpack.i.h.bf16 %v2542_v37  ;;  %v2543_v28 = vunpack.i.l.bf16 %v2542_v37  ;;  %vm3788_vm5 = vmmov %vm3787_vm3 }
 0x396   : > { %v2557_v60 = vpop.permute.xlu0 %2556  ;;  %v2149_v31 = vpack.c.bf16 %v1494_v27, %v1493_v33  ;;  %vm3789_vm7 = vmmov %vm3787_vm3 }
 0x397   : > { %v2559_v47 = vunpack.i.h.bf16 %v2557_v60  ;;  %v2558_v7 = vunpack.i.l.bf16 %v2557_v60  ;;  %v1490_v15 = vsel %vm3783_vm6, %v2554_v17, %v2544_v40  ;;  %v1489_v58 = vsel %vm3784_vm8, %v2553_v41, %v2543_v28  ;;  %vm3791_vm6 = vmmov %vm3787_vm3 }
 0x398   : > { %v2146_v49 = vpack.c.bf16 %v1490_v15, %v1489_v58  ;;  %v2547_v8 = vpop.permute.xlu1 %2546  ;;  %v1492_v30 = vsel %vm3789_vm7, %v2529_v35, %v2534_v44  ;;  %vm3792_vm8 = vmmov %vm3787_vm3 }
 0x399   : > { %v1485_v32 = vsel %vm3785_vm11, %v2543_v28, %v2558_v7  ;;  %v1486_v59 = vsel %vm3786_vm4, %v2544_v40, %v2559_v47  ;;  %v1497_v63 = vsel %vm3787_vm3, %v2558_v7, %v2538_v6  ;;  %v1498_v53 = vsel %vm3788_vm5, %v2559_v47, %v2539_v26  ;;  %vm3793_vm11 = vmmov %vm3787_vm3 }
 0x39a   : > { %v2175_v51 = vpack.c.bf16 %v1486_v59, %v1485_v32  ;;  %v2549_v54 = vunpack.i.h.bf16 %v2547_v8  ;;  %v2548_v55 = vunpack.i.l.bf16 %v2547_v8  ;;  %v2562_v34 = vpop.permute.xlu0 %2561  ;;  %v2172_v56 = vpack.c.bf16 %v1498_v53, %v1497_v63  ;;  %2147 = vmatprep.subr.msk.bf16.mxu0 %vm2882_vm15, %v2146_v49  ;;  %vm3794_vm4 = vmmov %vm3787_vm3 }
 0x39b   : > { %v2564_v38 = vunpack.i.h.bf16 %v2562_v34  ;;  %v2563_v36 = vunpack.i.l.bf16 %v2562_v34  ;;  %2150 = vmatpush1.bf16.msk.msra.mxu0 %vm2891_vm1, %v2149_v31  ;;  %v2155_v0 = vpack.c.bf16 %v1492_v30, %v1491_v43 }
 0x39c   : > { %v1488_v29 = vsel %vm3790_vm10, %v2534_v44, %v2549_v54  ;;  %v1487_v23 = vsel %vm3791_vm6, %v2533_v48, %v2548_v55  ;;  %v2567_v11 = vpop.permute.xlu1 %2566  ;;  %2173 = vmatprep.subr.msk.bf16.mxu1 %vm2863_vm13, %v2172_v56 }
 0x39d   : > { %v2152_v18 = vpack.c.bf16 %v1488_v29, %v1487_v23  ;;  %v1483_v4 = vsel %vm3792_vm8, %v2548_v55, %v2563_v36  ;;  %v1484_v1 = vsel %vm3793_vm11, %v2549_v54, %v2564_v38  ;;  %v1495_v46 = vsel %vm3794_vm4, %v2563_v36, %v2528_v2  ;;  %2176 = vmatpush1.bf16.msk.msra.mxu1 %vm2873_vm14, %v2175_v51 }
 0x39e   : > { %v1496_v16 = vsel %vm3787_vm3, %v2564_v38, %v2529_v35  ;;  %v2181_v10 = vpack.c.bf16 %v1484_v1, %v1483_v4  ;;  %v2582_v26 = vpop.permute.xlu0 %2581  ;;  %v2569_v48 = vunpack.i.h.bf16 %v2567_v11  ;;  %v2568_v33 = vunpack.i.l.bf16 %v2567_v11 }
 0x39f   : > { %v2178_v6 = vpack.c.bf16 %v1496_v16, %v1495_v46  ;;  %2153 = vmatprep.subr.msk.bf16.mxu0 %vm2882_vm15, %v2152_v18  ;;  %v2584_v20 = vunpack.i.h.bf16 %v2582_v26  ;;  %vm3795_vm15 = vcmp.lt.s32.totalorder %v2737_v22, 1  ;;  %v2583_v35 = vunpack.i.l.bf16 %v2582_v26  ;;  %v2613_v18 = vld [vmem:[%s3637_s5] sm:$0xff]  }
 0x3a0   : > { %2156 = vmatpush1.bf16.msk.msra.mxu0 %vm2891_vm1, %v2155_v0  ;;  %v2572_v17 = vpop.permute.xlu1 %2571  ;;  %vm3796_vm1 = vmmov %vm3795_vm15  ;;  %v3810_v22 = vld [vmem:[#allocation2_spill] sm:$0xff] }
 0x3a1   : > { %1592 = vmatprep.subr.bf16.mxu0 %v3428_v39  ;;  %2179 = vmatprep.subr.msk.bf16.mxu1 %vm2863_vm13, %v2178_v6  ;;  %v2574_v25 = vunpack.i.h.bf16 %v2572_v17  ;;  %v2573_v9 = vunpack.i.l.bf16 %v2572_v17  ;;  %vm3797_vm13 = vmmov %vm3796_vm1 }
 0x3a2   : > { %2182 = vmatpush1.bf16.msk.msra.mxu1 %vm2873_vm14, %v2181_v10  ;;  %v2592_v41 = vpop.permute.xlu0 %2591  ;;  %vm3798_vm14 = vmmov %vm3796_vm1 }
 0x3a3   : > { %v2594_v27 = vunpack.i.h.bf16 %v2592_v41  ;;  %v2593_v37 = vunpack.i.l.bf16 %v2592_v41  ;;  %1645 = vmatprep.subr.bf16.mxu1 %v3431_v62  ;;  %vm3799_vm5 = vmmov %vm3796_vm1 }
 0x3a4   : > { %1593 = vmatpush1.bf16.msra.mxu0 %v3423_v14  ;;  %v2577_v2 = vpop.permute.xlu1 %2576  ;;  %vm3800_vm7 = vmmov %vm3796_vm1 }
 0x3a5   : > { %v1429_v39 = vsel %vm3795_vm15, %v2568_v33, %v2593_v37  ;;  %v1430_v3 = vsel %vm3796_vm1, %v2569_v48, %v2594_v27  ;;  %1594 = vmatprep.subr.bf16.mxu0 %v3419_v21  ;;  %v2579_v28 = vunpack.i.h.bf16 %v2577_v2  ;;  %v2578_v60 = vunpack.i.l.bf16 %v2577_v2  ;;  %vm3801_vm10 = vmmov %vm3796_vm1 }
 0x3a6   : > { %v2158_v40 = vpack.c.bf16 %v1430_v3, %v1429_v39  ;;  %1646 = vmatpush1.bf16.msra.mxu1 %v3425_v24  ;;  %v2597_v62 = vpop.permute.xlu0 %2596  ;;  %v1425_v47 = vsel %vm3797_vm13, %v2593_v37, %v2573_v9  ;;  %v1426_v7 = vsel %vm3798_vm14, %v2594_v27, %v2574_v25  ;;  %vm3802_vm6 = vmmov %vm3796_vm1 }
 0x3a7   : > { %v2599_v14 = vunpack.i.h.bf16 %v2597_v62  ;;  %v2598_v44 = vunpack.i.l.bf16 %v2597_v62  ;;  %1647 = vmatprep.subr.bf16.mxu1 %v3421_v45  ;;  %v1428_v21 = vsel %vm3799_vm5, %v2579_v28, %v2584_v20  ;;  %v1427_v24 = vsel %vm3800_vm7, %v2578_v60, %v2583_v35  ;;  %vm3803_vm8 = vmmov %vm3796_vm1 }
 0x3a8   : > { %1595 = vmatpush1.bf16.msra.mxu0 %v3413_v19  ;;  %v2587_v15 = vpop.permute.xlu1 %2586  ;;  %vm3804_vm11 = vmmov %vm3796_vm1  ;;  %v2187_v51 = vpack.c.bf16 %v1426_v7, %v1425_v47  ;;  %v2164_v54 = vpack.c.bf16 %v1428_v21, %v1427_v24  ;;  %vm1577_vm5 = vcmask 785408  }
 0x3a9   : > { %v1421_v43 = vsel %vm3801_vm10, %v2573_v9, %v2598_v44  ;;  %v1422_v45 = vsel %vm3802_vm6, %v2574_v25, %v2599_v14  ;;  %v1433_v31 = vsel %vm3803_vm8, %v2598_v44, %v2568_v33  ;;  %2159 = vmatprep.subr.msk.bf16.mxu0 %vm2920_vm0, %v2158_v40  ;;  %v1434_v58 = vsel %vm3804_vm11, %v2599_v14, %v2569_v48  ;;  %vm3805_vm4 = vmmov %vm3796_vm1 }
 0x3aa   : > { %v2184_v19 = vpack.c.bf16 %v1422_v45, %v1421_v43  ;;  %v2589_v49 = vunpack.i.h.bf16 %v2587_v15  ;;  %v2588_v32 = vunpack.i.l.bf16 %v2587_v15  ;;  %1648 = vmatpush1.bf16.msra.mxu1 %v3415_v5  ;;  %v2602_v59 = vpop.permute.xlu0 %2601  ;;  %v2161_v63 = vpack.c.bf16 %v1434_v58, %v1433_v31  ;;  %vm3806_vm3 = vmmov %vm3796_vm1 }
 0x3ab   : > { %v2604_v8 = vunpack.i.h.bf16 %v2602_v59  ;;  %v2603_v53 = vunpack.i.l.bf16 %v2602_v59  ;;  %vm3807_vm15 = vmmov %vm3796_vm1 }
 0x3ac   : > { %v1424_v55 = vsel %vm3805_vm4, %v2584_v20, %v2589_v49  ;;  %2185 = vmatprep.subr.msk.bf16.mxu1 %vm2934_vm2, %v2184_v19  ;;  %v1423_v34 = vsel %vm3806_vm3, %v2583_v35, %v2588_v32  ;;  %vm3808_vm13 = vmmov %vm3796_vm1  ;;  %2162 = vmatpush1.bf16.msk.msra.mxu0 %vm2953_vm9, %v2161_v63 }
 0x3ad   : > { %v1419_v30 = vsel %vm3807_vm15, %v2588_v32, %v2603_v53  ;;  %v1420_v5 = vsel %vm3796_vm1, %v2589_v49, %v2604_v8  ;;  %v1431_v56 = vsel %vm3808_vm13, %v2603_v53, %v2578_v60  ;;  %vm3809_vm14 = vmmov %vm3796_vm1  ;;  %2165 = vmatprep.subr.msk.bf16.mxu0 %vm2920_vm0, %v2164_v54  ;;  %v2193_v23 = vpack.c.bf16 %v1424_v55, %v1423_v34 }
 0x3ae   : > { %v1432_v38 = vsel %vm3809_vm14, %v2604_v8, %v2579_v28  ;;  %v2190_v36 = vpack.c.bf16 %v1420_v5, %v1419_v30  ;;  %2188 = vmatpush1.bf16.msk.msra.mxu1 %vm3745_vm12, %v2187_v51  ;;  %vm1744_vm0 = vcmask 130048  }
 0x3af   : > { %v2167_v29 = vpack.c.bf16 %v1432_v38, %v1431_v56 }
 0x3b0   : > { %2191 = vmatprep.subr.msk.bf16.mxu1 %vm2934_vm2, %v2190_v36 }
 0x3b1   : > { %2168 = vmatpush1.bf16.msk.msra.mxu0 %vm2953_vm9, %v2167_v29 }
 0x3b2   : > { %2194 = vmatpush1.bf16.msk.msra.mxu1 %vm3745_vm12, %v2193_v23  ;;  %1765 = vmatprep.subr.bf16.mxu0 %v2702_v12  ;;  %v2615_v12 = vld [vmem:[%s3639_s7] sm:$0xff]  }
 0x3b3   : > { %1818 = vmatprep.subr.bf16.mxu1 %v2704_v13  ;;  %v2616_v13 = vld [vmem:[%s3639_s7 + $0x8] sm:$0xff]  }
 0x3b4   : > { %2169 = vmatmul.mubr.msk.bf16.vlgmr.msra.gmra.mxu0 %vm1577_vm5, %v2613_v18 }
 0x3b5   : > { %2195 = vmatmul.mubr.msk.bf16.vlgmr.msra.gmra.mxu1 %vm1577_vm5, %v2613_v18  ;;  %1766 = vmatpush1.bf16.msra.mxu0 %v3810_v22  ;;  %v1550_v46 = vpop.permute.xlu1 %1549 }
 0x3b6   : > { %1819 = vmatpush1.bf16.msra.mxu1 %v3811_v42  ;;  %1626 = vmatprep.mubr.bf16.mxu0 %v3779_v52 }
 0x3b7   : > { %1679 = vmatprep.mubr.bf16.mxu1 %v3779_v52  ;;  %v1555_v26 = vpop.permute.xlu0 %1554 }
 0x3bb   : > { %v3595_v20 = vpop.permute.xlu0 %1564 }
 0x3bc   : > { %2170 = vmatmul.mubr.msk.bf16.gmra.mxu0 %vm1577_vm5, %v2614_v50 }
 0x3bd   : > { %2196 = vmatmul.mubr.msk.bf16.gmra.mxu1 %vm1577_vm5, %v2614_v50  ;;  %1783 = vmatprep.mubr.bf16.mxu0 %v3779_v52 }
 0x3be   : > { %1836 = vmatprep.mubr.bf16.mxu1 %v3779_v52 }
 0x3bf   : > { %v1722_v58 = vpop.permute.xlu0 %1721 }
 0x3c4   : > { %2199 = vmatmul.mubr.msk.bf16.vlgmr.msra.gmra.mxu0 %vm1744_vm0, %v2615_v12 }
 0x3c5   : > { %2201 = vmatmul.mubr.msk.bf16.vlgmr.msra.gmra.mxu1 %vm1744_vm0, %v2615_v12  ;;  %1793 = vmatprep.mubr.bf16.mxu0 %v3779_v52 }
 0x3c6   : > { %1846 = vmatprep.mubr.bf16.mxu1 %v3779_v52  ;;  %v1560_v52 = vpop.permute.xlu1 %1559 }
 0x3ca   : > { %v1717_v9 = vpop.permute.xlu1 %1716 }
 0x3cc   : > { %2200 = vmatmul.mubr.msk.bf16.gmra.mxu0 %vm1744_vm0, %v2616_v13 }
 0x3cd   : > { %2202 = vmatmul.mubr.msk.bf16.gmra.mxu1 %vm1744_vm0, %v2616_v13 }
 0x3ce   : > { %v1727_v42 = vpop.permute.xlu1 %1726 }
 0x474   : > { %v1618_v57 = vpop.f32.mrf.mxu0 }
 0x475   : > { %v1671_v61 = vpop.f32.mrf.mxu1  ;;  %v1619_v27 = vadd.f32 %v1618_v57, %v1550_v46 }
 0x476   : > { %v1620_v4 = vpop.f32.mrf.mxu0  ;;  %v1672_v25 = vadd.f32 %v1671_v61, %v1550_v46 }
 0x477   : > { %v1673_v1 = vpop.f32.mrf.mxu1  ;;  %v1621_v3 = vadd.f32 %v1620_v4, %v1550_v46  ;;  %v1690_v60 = vmax.f32 %v1619_v27, 0.0 }
 0x478   : > { %v1622_v11 = vpop.f32.mrf.mxu0  ;;  %v1674_v40 = vadd.f32 %v1673_v1, %v1550_v46  ;;  %v1692_v44 = vmax.f32 %v1672_v25, 0.0  ;;  %v1732_v25 = vpop.permute.xlu0 %1731 }
 0x479   : > { %v1675_v0 = vpop.f32.mrf.mxu1  ;;  %v1623_v62 = vadd.f32 %v1622_v11, %v1555_v26  ;;  %v1691_v24 = vmax.f32 %v1621_v3, 0.0 }
 0x47a   : > { %v1624_v16 = vpop.f32.mrf.mxu0  ;;  %v1676_v47 = vadd.f32 %v1675_v0, %v1555_v26  ;;  %v1693_v19 = vmax.f32 %v1674_v40, 0.0 }
 0x47b   : > { %v1677_v10 = vpop.f32.mrf.mxu1  ;;  %v1625_v43 = vadd.f32 %v1624_v16, %v1555_v26  ;;  %v1694_v8 = vmax.f32 %v1623_v62, 0.0 }
 0x47c   : > { %v1628_v6 = vpop.f32.mrf.mxu0  ;;  %v1678_v49 = vadd.f32 %v1677_v10, %v1555_v26  ;;  %v1696_v34 = vmax.f32 %v1676_v47, 0.0 }
 0x47d   : > { %v1681_v17 = vpop.f32.mrf.mxu1  ;;  %v1629_v53 = vadd.f32 %v1628_v6, %v1560_v52  ;;  %v1695_v36 = vmax.f32 %v1625_v43, 0.0 }
 0x47e   : > { %v1630_v41 = vpop.f32.mrf.mxu0  ;;  %v1682_v30 = vadd.f32 %v1681_v17, %v1560_v52  ;;  %v1697_v50 = vmax.f32 %v1678_v49, 0.0 }
 0x47f   : > { %v1683_v48 = vpop.f32.mrf.mxu1  ;;  %v1631_v29 = vadd.f32 %v1630_v41, %v1560_v52  ;;  %v1698_v4 = vmax.f32 %v1629_v53, 0.0 }
 0x480   : > { %v1632_v33 = vpop.f32.mrf.mxu0  ;;  %v1684_v12 = vadd.f32 %v1683_v48, %v1560_v52  ;;  %v1700_v16 = vmax.f32 %v1682_v30, 0.0 }
 0x481   : > { %v1685_v37 = vpop.f32.mrf.mxu1  ;;  %v1633_v1 = vadd.f32 %v1632_v33, %v3595_v20  ;;  %v1699_v52 = vmax.f32 %v1631_v29, 0.0 }
 0x482   : > { %v3597_v39 = vpop.f32.mrf.mxu0  ;;  %v1686_v10 = vadd.f32 %v1685_v37, %v3595_v20  ;;  %v1701_v3 = vmax.f32 %v1684_v12, 0.0 }
 0x483   : > { %v3600_v2 = vpop.f32.mrf.mxu1  ;;  %v1635_v41 = vadd.f32 %v3597_v39, %v3595_v20 }
 0x484   : > { %v1785_v28 = vpop.f32.mrf.mxu0 }
 0x485   : > { %v1786_v35 = vadd.f32 %v1785_v28, %v1717_v9  ;;  %v1838_v14 = vpop.f32.mrf.mxu1 }
 0x486   : > { %v1839_v7 = vadd.f32 %v1838_v14, %v1717_v9  ;;  %v1787_v21 = vpop.f32.mrf.mxu0  ;;  %v1704_v14 = vmax.f32 %v1686_v10, 0.0 }
 0x487   : > { %v1857_v45 = vadd.f32 %v1786_v35, %v1690_v60  ;;  %v1788_v31 = vadd.f32 %v1787_v21, %v1717_v9  ;;  %v1840_v15 = vpop.f32.mrf.mxu1  ;;  %v1702_v60 = vmax.f32 %v1633_v1, 0.0 }
 0x488   : > { %v1859_v32 = vadd.f32 %v1839_v7, %v1692_v44  ;;  %v1841_v59 = vadd.f32 %v1840_v15, %v1717_v9  ;;  %v1789_v63 = vpop.f32.mrf.mxu0  ;;  %v1688_v9 = vadd.f32 %v3600_v2, %v3595_v20  ;;  %v1703_v2 = vmax.f32 %v1635_v41, 0.0 }
 0x489   : > { %1873 = vst [vmem:[%s3605_s19] sm:$0xff] %v1857_v45  ;;  %v1858_v51 = vadd.f32 %v1788_v31, %v1691_v24  ;;  %v1790_v54 = vadd.f32 %v1789_v63, %v1722_v58  ;;  %v1842_v55 = vpop.f32.mrf.mxu1 }
 0x48a   : > { %1875 = vst [vmem:[%s3605_s19 + $0x10] sm:$0xff] %v1859_v32  ;;  %v1860_v5 = vadd.f32 %v1841_v59, %v1693_v19  ;;  %v1843_v56 = vadd.f32 %v1842_v55, %v1722_v58  ;;  %v1791_v38 = vpop.f32.mrf.mxu0  ;;  %v1705_v43 = vmax.f32 %v1688_v9, 0.0 }
 0x48b   : > { %1874 = vst [vmem:[%s3605_s19 + $0x8] sm:$0xff] %v1858_v51  ;;  %v1861_v23 = vadd.f32 %v1790_v54, %v1694_v8  ;;  %v1792_v18 = vadd.f32 %v1791_v38, %v1722_v58  ;;  %v1844_v22 = vpop.f32.mrf.mxu1 }
 0x48c   : > { %1876 = vst [vmem:[%s3605_s19 + $0x18] sm:$0xff] %v1860_v5  ;;  %v1863_v13 = vadd.f32 %v1843_v56, %v1696_v34  ;;  %v1845_v57 = vadd.f32 %v1844_v22, %v1722_v58  ;;  %v1795_v61 = vpop.f32.mrf.mxu0 }
 0x48d   : > { %1877 = vst [vmem:[%s3605_s19 + $0x20] sm:$0xff] %v1861_v23  ;;  %v1862_v46 = vadd.f32 %v1792_v18, %v1695_v36  ;;  %v1796_v11 = vadd.f32 %v1795_v61, %v1727_v42  ;;  %v1848_v0 = vpop.f32.mrf.mxu1 }
 0x48e   : > { %1879 = vst [vmem:[%s3605_s19 + $0x30] sm:$0xff] %v1863_v13  ;;  %v1864_v26 = vadd.f32 %v1845_v57, %v1697_v50  ;;  %v1849_v6 = vadd.f32 %v1848_v0, %v1727_v42  ;;  %v1797_v17 = vpop.f32.mrf.mxu0 }
 0x48f   : > { %1878 = vst [vmem:[%s3605_s19 + $0x28] sm:$0xff] %v1862_v46  ;;  %v1865_v48 = vadd.f32 %v1796_v11, %v1698_v4  ;;  %v1798_v33 = vadd.f32 %v1797_v17, %v1727_v42  ;;  %v1850_v27 = vpop.f32.mrf.mxu1 }
 0x490   : > { %1880 = vst [vmem:[%s3605_s19 + $0x38] sm:$0xff] %v1864_v26  ;;  %v1867_v37 = vadd.f32 %v1849_v6, %v1700_v16  ;;  %v1851_v40 = vadd.f32 %v1850_v27, %v1727_v42  ;;  %v1799_v28 = vpop.f32.mrf.mxu0 }
 0x491   : > { %1881 = vst [vmem:[%s3605_s19 + $0x40] sm:$0xff] %v1865_v48  ;;  %v1866_v62 = vadd.f32 %v1798_v33, %v1699_v52  ;;  %v1800_v39 = vadd.f32 %v1799_v28, %v1732_v25  ;;  %v1852_v35 = vpop.f32.mrf.mxu1 }
 0x492   : > { %1883 = vst [vmem:[%s3605_s19 + $0x50] sm:$0xff] %v1867_v37  ;;  %v1868_v44 = vadd.f32 %v1851_v40, %v1701_v3  ;;  %v1853_v47 = vadd.f32 %v1852_v35, %v1732_v25  ;;  %v1801_v20 = vpop.f32.mrf.mxu0 }
 0x493   : > { %1882 = vst [vmem:[%s3605_s19 + $0x48] sm:$0xff] %v1866_v62  ;;  %v1869_v7 = vadd.f32 %v1800_v39, %v1702_v60  ;;  %v1802_v21 = vadd.f32 %v1801_v20, %v1732_v25  ;;  %v1854_v24 = vpop.f32.mrf.mxu1 }
 0x494   : > { %1884 = vst [vmem:[%s3605_s19 + $0x58] sm:$0xff] %v1868_v44  ;;  %v1871_v45 = vadd.f32 %v1853_v47, %v1704_v14  ;;  %v1855_v31 = vadd.f32 %v1854_v24, %v1732_v25 }
 0x495   : > { %1885 = vst [vmem:[%s3605_s19 + $0x60] sm:$0xff] %v1869_v7  ;;  %v1870_v15 = vadd.f32 %v1802_v21, %v1703_v2 }
 0x496   : > { %1887 = vst [vmem:[%s3605_s19 + $0x70] sm:$0xff] %v1871_v45  ;;  %v1872_v58 = vadd.f32 %v1855_v31, %v1705_v43 }
 0x497   : > { %1886 = vst [vmem:[%s3605_s19 + $0x68] sm:$0xff] %v1870_v15 }
 0x498   : > { %1888 = vst [vmem:[%s3605_s19 + $0x78] sm:$0xff] %v1872_v58 }
 0x499 PF: > { %s19_s30 = sadd.s32 1, %s2623_s30  }
 0x49a   : > { %p16_p4 = scmp.ge.s32.totalorder %s19_s30, 4  }
 0x49c   :  { %18 = sbr.rel (!%p16_p4) target bundleno = 1 (0x1), region = 86 }

</bundles_post_ra>
